<compile_context>
chip_gen: v6e
topology: v6e:2x2x1
jax: 0.10.0
libtpu: 0.0.40
codegen_flags: <defaults>
</compile_context>

<pallas_src>
import functools

import numpy as np

import jax
import jax.numpy as jnp
from jax import lax
from jax.experimental import pallas as pl
from jax.experimental.pallas import tpu as pltpu


def _round_up(n, m):
    return -(-n // m) * m


# ------------------------------ fused kernel ------------------------------- #

def _net_fused_kernel(x_ref, t1_ref, b1_ref, t2_ref, b2_ref, fcw_ref, fcb_ref,
                      out_ref):
    """Whole forward pass for one batch tile of `tb` images.

    x_ref   : (28, tb, 128) f32  input rows, layout (h, b, w); w zero-padded to 128
    t1_ref  : (640, 256)  bf16   conv1 Toeplitz slab, K = (kernel_row, w_in)
    b1_ref  : (1, 128)    f32    conv1 bias in post-pool lane layout
    t2_ref  : (640, 256)  bf16   conv2 Toeplitz slab
    b2_ref  : (1, 128)    f32    conv2 bias in post-pool lane layout
    fcw_ref : (512, 128)  bf16   fc weight (torch NCHW flatten order folded in)
    fcb_ref : (1, 128)    f32    fc bias (lanes 10.. = -1e30)
    out_ref : (tb, 128)   f32    log-probabilities live in lanes [:10]
    """
    tb = x_ref.shape[1]

    def conv(src, n_out, t_ref):
        # Valid 5-tap convolution along the row axis as ONE MXU matmul:
        # lane-concat the 5 row-shifted slices at 128-aligned K offsets (pure
        # vreg placement, no lane-crossing), so the MXU accumulates over K=640.
        pieces = [
            src[i:i + n_out].reshape(n_out * tb, 128).astype(t_ref.dtype)
            for i in range(5)
        ]
        lhs = jnp.concatenate(pieces, axis=-1)                 # (n_out*tb, 640) bf16
        return jnp.dot(lhs, t_ref[...], preferred_element_type=jnp.float32)

    def pool_bias_relu(y, n_half, b_ref):
        # y: (2*n_half*tb, 256), rows ordered (h, b); lanes packed (dw, wp, c)
        # with each parity half padded to 128 lanes.  Bias + ReLU applied AFTER
        # pooling (they commute with max) -> 4x less VPU work and traffic.
        y = y.reshape(n_half, 2, tb, 256)                      # split h -> (hp, dh)
        ph = jnp.maximum(y[:, 0], y[:, 1])                     # pool over rows
        p = jnp.maximum(ph[..., :128], ph[..., 128:])          # pool over columns
        return jnp.maximum(p + b_ref[...], 0.0)                # (n_half, tb, 128)

    x = x_ref[...]                                             # (28, tb, 128) f32

    # conv1 (1 -> 10, k=5) -> pool -> bias -> ReLU
    z1 = pool_bias_relu(conv(x, 24, t1_ref), 12, b1_ref)       # (12, tb, 128)
    # conv2 (10 -> 20, k=5) -> pool -> bias -> ReLU
    z2 = pool_bias_relu(conv(z1, 8, t2_ref), 4, b2_ref)        # (4, tb, 128)

    # fc(320 -> 10): lane-concat the 4 h-slabs (128-aligned, free) -> (tb, 512),
    # single matmul against the row-permuted, column-padded fc weight.
    flat = jnp.concatenate([z2[h] for h in range(4)], axis=-1)  # (tb, 512) f32
    logits = jnp.dot(flat.astype(fcw_ref.dtype), fcw_ref[...],
                     preferred_element_type=jnp.float32) + fcb_ref[...]

    # Numerically stable log_softmax; pad lanes carry ~-1e30 logits -> exp == 0,
    # so only the 10 real classes contribute to the denominator.
    m = jnp.max(logits, axis=-1, keepdims=True)
    s = logits - m
    lse = jnp.log(jnp.sum(jnp.exp(s), axis=-1, keepdims=True))
    out_ref[...] = s - lse


# ------------------------------ host wrapper -------------------------------- #

def net_forward(x_nchw, params, *, tb=128):
    """x_nchw: (B, 1, 28, 28) float32 -> (B, 10) log-probabilities."""
    B = x_nchw.shape[0]
    assert x_nchw.shape[1:] == (1, 28, 28), x_nchw.shape
    # Big batch tile amortizes per-grid-step overhead and fills the MXU; clamp for
    # tiny batches so we don't pad-and-compute dead work.  Multiple of 8 (f32 tile).
    tb = max(8, min(tb, _round_up(B, 8)))
    nb = pl.cdiv(B, tb)
    Bp = nb * tb

    x = x_nchw.reshape(B, 28, 28)
    # Pad batch up to the grid and width 28 -> 128 (zero lanes; the matching
    # Toeplitz weight rows are zero, so this is exact), then arrange as (h, b, w):
    # every in-kernel window shift / pool step is a leading-dim or 128-aligned op.
    x = jnp.pad(x, ((0, Bp - B), (0, 0), (0, 128 - 28)))
    x_t = jnp.transpose(x, (1, 0, 2))                          # (28, Bp, 128)

    out = pl.pallas_call(
        _net_fused_kernel,
        out_shape=jax.ShapeDtypeStruct((Bp, 128), jnp.float32),
        grid=(nb,),
        in_specs=[
            pl.BlockSpec((28, tb, 128), lambda g: (0, g, 0)),   # x tile
            pl.BlockSpec((640, 256), lambda g: (0, 0)),         # t1 (bf16)
            pl.BlockSpec((1, 128), lambda g: (0, 0)),           # b1 post-pool
            pl.BlockSpec((640, 256), lambda g: (0, 0)),         # t2 (bf16)
            pl.BlockSpec((1, 128), lambda g: (0, 0)),           # b2 post-pool
            pl.BlockSpec((512, 128), lambda g: (0, 0)),         # fc weight (bf16)
            pl.BlockSpec((1, 128), lambda g: (0, 0)),           # fc bias
        ],
        out_specs=pl.BlockSpec((tb, 128), lambda g: (g, 0)),
        compiler_params=pltpu.CompilerParams(
            dimension_semantics=("parallel",),      # batch tiles shard across TCs
            vmem_limit_bytes=32 * 1024 * 1024,      # ~16-20 MiB live at tb=128
        ),
    )(x_t, params["t1"], params["b1p"], params["t2"], params["b2p"],
      params["fcw"], params["fcb"])
    return out[:B, :10]


# --------------------- weight packing (init-time, host) --------------------- #

def pack_params(w1, b1, w2, b2, fcw, fcb):
    """PyTorch-layout weights -> fused-kernel layouts (matmul weights in bf16).

    w1: (10,1,5,5), b1: (10,), w2: (20,10,5,5), b2: (20,),
    fcw: (10,320) torch Linear weight (out, in), fcb: (10,).
    Conv output lane packing: lane = dw*128 + wp*C + c with w_out = 2*wp + dw, so
    the 2x2 width pool is a max of the two 128-lane halves.  Biases are packed in
    the POST-pool layout (lane = wp*C + c).  Unused lanes carry zero weights.
    """
    w1 = np.asarray(w1, np.float32); b1 = np.asarray(b1, np.float32)
    w2 = np.asarray(w2, np.float32); b2 = np.asarray(b2, np.float32)
    fcw = np.asarray(fcw, np.float32); fcb = np.asarray(fcb, np.float32)
    C1, C2 = 10, 20

    # conv1 Toeplitz slab: K row = ki*128 + w_in  (w_in = w_out + kj < 28; rows
    # 28..127 of each 128-block stay zero, matching the zero-padded input lanes).
    t1 = np.zeros((5 * 128, 256), np.float32)
    for dw in range(2):
        for wp in range(12):
            w_out = 2 * wp + dw
            col0 = dw * 128 + wp * C1
            for ki in range(5):
                for kj in range(5):
                    t1[ki * 128 + w_out + kj, col0:col0 + C1] = w1[:, 0, ki, kj]
    b1p = np.zeros((1, 128), np.float32)
    for wp in range(12):
        b1p[0, wp * C1:(wp + 1) * C1] = b1

    # conv2 Toeplitz slab: K row = ki*128 + win*C1 + c1 (win = pooled-1 width).
    t2 = np.zeros((5 * 128, 256), np.float32)
    for dw in range(2):
        for wp2 in range(4):
            w_out2 = 2 * wp2 + dw
            col0 = dw * 128 + wp2 * C2
            for ki in range(5):
                for kj in range(5):
                    win = w_out2 + kj
                    for c1 in range(C1):
                        t2[ki * 128 + win * C1 + c1, col0:col0 + C2] = w2[:, c1, ki, kj]
    b2p = np.zeros((1, 128), np.float32)
    for wp2 in range(4):
        b2p[0, wp2 * C2:(wp2 + 1) * C2] = b2

    # fc weight: LHS lane = h*128 + wp2*C2 + c2 (lane-concat of z2's 4 h-slabs);
    # torch NCHW flatten index = c2*16 + h*4 + wp2.  Output padded to 128 lanes:
    # cols 10..127 zero weights, pad bias -1e30 so log_softmax ignores them.
    fcw_r = np.zeros((512, 128), np.float32)
    for h in range(4):
        for wp2 in range(4):
            for c2 in range(C2):
                fcw_r[h * 128 + wp2 * C2 + c2, :10] = fcw[:, c2 * 16 + h * 4 + wp2]
    fcb_r = np.full((1, 128), -1e30, np.float32)
    fcb_r[0, :10] = fcb

    return {
        "t1": jnp.asarray(t1, jnp.bfloat16), "b1p": jnp.asarray(b1p),
        "t2": jnp.asarray(t2, jnp.bfloat16), "b2p": jnp.asarray(b2p),
        "fcw": jnp.asarray(fcw_r, jnp.bfloat16), "fcb": jnp.asarray(fcb_r),
    }


# ------------------------- pure-JAX reference model ------------------------- #

def _maxpool2(y):
    B, C, H, W = y.shape
    return y.reshape(B, C, H // 2, 2, W // 2, 2).max(axis=(3, 5))


def net_reference(x, w1, b1, w2, b2, fcw, fcb):
    dn = ("NCHW", "OIHW", "NCHW")
    y = lax.conv_general_dilated(x, w1, (1, 1), "VALID", dimension_numbers=dn,
                                 precision=lax.Precision.HIGHEST)
    y = jax.nn.relu(_maxpool2(y + b1[None, :, None, None]))
    y = lax.conv_general_dilated(y, w2, (1, 1), "VALID", dimension_numbers=dn,
                                 precision=lax.Precision.HIGHEST)
    y = jax.nn.relu(_maxpool2(y + b2[None, :, None, None]))
    flat = y.reshape(x.shape[0], -1)
    logits = jnp.dot(flat, fcw.T, precision=lax.Precision.HIGHEST) + fcb
    return jax.nn.log_softmax(logits, axis=-1)


# ----------------------------------- main ----------------------------------- #

if __name__ == "__main__":
    key = jax.random.PRNGKey(0)
    kp, kx = jax.random.split(key)
    k1, k2, k3, k4, k5, k6 = jax.random.split(kp, 6)

    # PyTorch-layout parameters (deterministic).
    w1 = jax.random.normal(k1, (10, 1, 5, 5), jnp.float32) * 0.1
    b1 = jax.random.normal(k2, (10,), jnp.float32) * 0.1
    w2 = jax.random.normal(k3, (20, 10, 5, 5), jnp.float32) * 0.1
    b2 = jax.random.normal(k4, (20,), jnp.float32) * 0.1
    fcw = jax.random.normal(k5, (10, 320), jnp.float32) * 0.05
    fcb = jax.random.normal(k6, (10,), jnp.float32) * 0.05

    params = pack_params(w1, b1, w2, b2, fcw, fcb)

    # fc expects 320 = 20*4*4 features, which fixes 28x28 spatial input.
    x = jax.random.normal(kx, (2, 1, 28, 28), jnp.float32)

    fwd = jax.jit(functools.partial(net_forward, tb=128))
    out = jax.block_until_ready(fwd(x, params))
    assert out.shape == (2, 10) and out.dtype == jnp.float32

    ref = jax.block_until_ready(net_reference(x, w1, b1, w2, b2, fcw, fcb))
    max_err = float(jnp.max(jnp.abs(out - ref)))
    assert max_err < 5e-2, f"mismatch vs pure-JAX reference (bf16 MXU path): {max_err}"

    print("KERNEL_OK")
</pallas_src>

<mosaic_0001>
module attributes {stable_mosaic.version = 11 : i64} {
  func.func @_net_fused_kernel(%arg0: i32, %arg1: memref<28x8x128xf32, #tpu.memory_space<vmem>>, %arg2: memref<640x256xbf16, #tpu.memory_space<vmem>>, %arg3: memref<1x128xf32, #tpu.memory_space<vmem>>, %arg4: memref<640x256xbf16, #tpu.memory_space<vmem>>, %arg5: memref<1x128xf32, #tpu.memory_space<vmem>>, %arg6: memref<512x128xbf16, #tpu.memory_space<vmem>>, %arg7: memref<1x128xf32, #tpu.memory_space<vmem>>, %arg8: memref<8x128xf32, #tpu.memory_space<vmem>>) attributes {dimension_semantics = [#tpu.dimension_semantics<parallel>], iteration_bounds = array<i64: 1>, scalar_prefetch = 0 : i64, scratch_operands = 0 : i64, tpu.core_type = #tpu.core_type<tc>, window_params = [{transform_indices = @transform_0, window_bounds = array<i64: 28, 8, 128>}, {pipeline_mode = #tpu.pipeline_mode<synchronous>, transform_indices = @transform_1, window_bounds = array<i64: 640, 256>}, {pipeline_mode = #tpu.pipeline_mode<synchronous>, transform_indices = @transform_2, window_bounds = array<i64: 1, 128>}, {pipeline_mode = #tpu.pipeline_mode<synchronous>, transform_indices = @transform_3, window_bounds = array<i64: 640, 256>}, {pipeline_mode = #tpu.pipeline_mode<synchronous>, transform_indices = @transform_4, window_bounds = array<i64: 1, 128>}, {pipeline_mode = #tpu.pipeline_mode<synchronous>, transform_indices = @transform_5, window_bounds = array<i64: 512, 128>}, {pipeline_mode = #tpu.pipeline_mode<synchronous>, transform_indices = @transform_6, window_bounds = array<i64: 1, 128>}, {transform_indices = @transform_7, window_bounds = array<i64: 8, 128>}]} {
    %c0 = arith.constant 0 : index
    %c0_0 = arith.constant 0 : index
    %c0_1 = arith.constant 0 : index
    %0 = vector.load %arg1[%c0, %c0_0, %c0_1] : memref<28x8x128xf32, #tpu.memory_space<vmem>>, vector<28x8x128xf32>
    %1 = vector.extract_strided_slice %0 {offsets = [0, 0, 0], sizes = [24, 8, 128], strides = [1, 1, 1]} : vector<28x8x128xf32> to vector<24x8x128xf32>
    %2 = vector.shape_cast %1 : vector<24x8x128xf32> to vector<192x128xf32>
    %3 = arith.truncf %2 : vector<192x128xf32> to vector<192x128xbf16>
    %4 = vector.extract_strided_slice %0 {offsets = [1, 0, 0], sizes = [24, 8, 128], strides = [1, 1, 1]} : vector<28x8x128xf32> to vector<24x8x128xf32>
    %5 = vector.shape_cast %4 : vector<24x8x128xf32> to vector<192x128xf32>
    %6 = arith.truncf %5 : vector<192x128xf32> to vector<192x128xbf16>
    %7 = vector.extract_strided_slice %0 {offsets = [2, 0, 0], sizes = [24, 8, 128], strides = [1, 1, 1]} : vector<28x8x128xf32> to vector<24x8x128xf32>
    %8 = vector.shape_cast %7 : vector<24x8x128xf32> to vector<192x128xf32>
    %9 = arith.truncf %8 : vector<192x128xf32> to vector<192x128xbf16>
    %10 = vector.extract_strided_slice %0 {offsets = [3, 0, 0], sizes = [24, 8, 128], strides = [1, 1, 1]} : vector<28x8x128xf32> to vector<24x8x128xf32>
    %11 = vector.shape_cast %10 : vector<24x8x128xf32> to vector<192x128xf32>
    %12 = arith.truncf %11 : vector<192x128xf32> to vector<192x128xbf16>
    %13 = vector.extract_strided_slice %0 {offsets = [4, 0, 0], sizes = [24, 8, 128], strides = [1, 1, 1]} : vector<28x8x128xf32> to vector<24x8x128xf32>
    %14 = vector.shape_cast %13 : vector<24x8x128xf32> to vector<192x128xf32>
    %15 = arith.truncf %14 : vector<192x128xf32> to vector<192x128xbf16>
    %16 = tpu.concatenate %3, %6, %9, %12, %15 in 1 : vector<192x128xbf16>, vector<192x128xbf16>, vector<192x128xbf16>, vector<192x128xbf16>, vector<192x128xbf16> -> vector<192x640xbf16>
    %c0_2 = arith.constant 0 : index
    %c0_3 = arith.constant 0 : index
    %17 = vector.load %arg2[%c0_2, %c0_3] : memref<640x256xbf16, #tpu.memory_space<vmem>>, vector<640x256xbf16>
    %cst = arith.constant dense<0.000000e+00> : vector<192x256xf32>
    %18 = tpu.matmul %16, %17, %cst {dimension_numbers = #tpu.dot_dimension_numbers<[1], [0], [0], [1], [0, 0, 1, 1], [], []>} : vector<192x640xbf16>, vector<640x256xbf16>, vector<192x256xf32> -> vector<192x256xf32>
    %19 = vector.shape_cast %18 : vector<192x256xf32> to vector<12x2x8x256xf32>
    %20 = vector.extract_strided_slice %19 {offsets = [0, 0, 0, 0], sizes = [12, 1, 8, 256], strides = [1, 1, 1, 1]} : vector<12x2x8x256xf32> to vector<12x1x8x256xf32>
    %21 = vector.shape_cast %20 : vector<12x1x8x256xf32> to vector<12x8x256xf32>
    %22 = vector.extract_strided_slice %19 {offsets = [0, 1, 0, 0], sizes = [12, 1, 8, 256], strides = [1, 1, 1, 1]} : vector<12x2x8x256xf32> to vector<12x1x8x256xf32>
    %23 = vector.shape_cast %22 : vector<12x1x8x256xf32> to vector<12x8x256xf32>
    %24 = arith.maximumf %21, %23 : vector<12x8x256xf32>
    %25 = vector.extract_strided_slice %24 {offsets = [0, 0, 0], sizes = [12, 8, 128], strides = [1, 1, 1]} : vector<12x8x256xf32> to vector<12x8x128xf32>
    %26 = vector.extract_strided_slice %24 {offsets = [0, 0, 128], sizes = [12, 8, 128], strides = [1, 1, 1]} : vector<12x8x256xf32> to vector<12x8x128xf32>
    %27 = arith.maximumf %25, %26 : vector<12x8x128xf32>
    %c0_4 = arith.constant 0 : index
    %c0_5 = arith.constant 0 : index
    %28 = vector.load %arg3[%c0_4, %c0_5] : memref<1x128xf32, #tpu.memory_space<vmem>>, vector<1x128xf32>
    %29 = vector.shape_cast %28 : vector<1x128xf32> to vector<1x1x128xf32>
    %30 = vector.broadcast %29 : vector<1x1x128xf32> to vector<12x8x128xf32>
    %31 = arith.addf %27, %30 : vector<12x8x128xf32>
    %cst_6 = arith.constant 0.000000e+00 : f32
    %32 = vector.broadcast %cst_6 : f32 to vector<12x8x128xf32>
    %33 = arith.maximumf %31, %32 : vector<12x8x128xf32>
    %34 = vector.extract_strided_slice %33 {offsets = [0, 0, 0], sizes = [8, 8, 128], strides = [1, 1, 1]} : vector<12x8x128xf32> to vector<8x8x128xf32>
    %35 = vector.shape_cast %34 : vector<8x8x128xf32> to vector<64x128xf32>
    %36 = arith.truncf %35 : vector<64x128xf32> to vector<64x128xbf16>
    %37 = vector.extract_strided_slice %33 {offsets = [1, 0, 0], sizes = [8, 8, 128], strides = [1, 1, 1]} : vector<12x8x128xf32> to vector<8x8x128xf32>
    %38 = vector.shape_cast %37 : vector<8x8x128xf32> to vector<64x128xf32>
    %39 = arith.truncf %38 : vector<64x128xf32> to vector<64x128xbf16>
    %40 = vector.extract_strided_slice %33 {offsets = [2, 0, 0], sizes = [8, 8, 128], strides = [1, 1, 1]} : vector<12x8x128xf32> to vector<8x8x128xf32>
    %41 = vector.shape_cast %40 : vector<8x8x128xf32> to vector<64x128xf32>
    %42 = arith.truncf %41 : vector<64x128xf32> to vector<64x128xbf16>
    %43 = vector.extract_strided_slice %33 {offsets = [3, 0, 0], sizes = [8, 8, 128], strides = [1, 1, 1]} : vector<12x8x128xf32> to vector<8x8x128xf32>
    %44 = vector.shape_cast %43 : vector<8x8x128xf32> to vector<64x128xf32>
    %45 = arith.truncf %44 : vector<64x128xf32> to vector<64x128xbf16>
    %46 = vector.extract_strided_slice %33 {offsets = [4, 0, 0], sizes = [8, 8, 128], strides = [1, 1, 1]} : vector<12x8x128xf32> to vector<8x8x128xf32>
    %47 = vector.shape_cast %46 : vector<8x8x128xf32> to vector<64x128xf32>
    %48 = arith.truncf %47 : vector<64x128xf32> to vector<64x128xbf16>
    %49 = tpu.concatenate %36, %39, %42, %45, %48 in 1 : vector<64x128xbf16>, vector<64x128xbf16>, vector<64x128xbf16>, vector<64x128xbf16>, vector<64x128xbf16> -> vector<64x640xbf16>
    %c0_7 = arith.constant 0 : index
    %c0_8 = arith.constant 0 : index
    %50 = vector.load %arg4[%c0_7, %c0_8] : memref<640x256xbf16, #tpu.memory_space<vmem>>, vector<640x256xbf16>
    %cst_9 = arith.constant dense<0.000000e+00> : vector<64x256xf32>
    %51 = tpu.matmul %49, %50, %cst_9 {dimension_numbers = #tpu.dot_dimension_numbers<[1], [0], [0], [1], [0, 0, 1, 1], [], []>} : vector<64x640xbf16>, vector<640x256xbf16>, vector<64x256xf32> -> vector<64x256xf32>
    %52 = vector.shape_cast %51 : vector<64x256xf32> to vector<4x2x8x256xf32>
    %53 = vector.extract_strided_slice %52 {offsets = [0, 0, 0, 0], sizes = [4, 1, 8, 256], strides = [1, 1, 1, 1]} : vector<4x2x8x256xf32> to vector<4x1x8x256xf32>
    %54 = vector.shape_cast %53 : vector<4x1x8x256xf32> to vector<4x8x256xf32>
    %55 = vector.extract_strided_slice %52 {offsets = [0, 1, 0, 0], sizes = [4, 1, 8, 256], strides = [1, 1, 1, 1]} : vector<4x2x8x256xf32> to vector<4x1x8x256xf32>
    %56 = vector.shape_cast %55 : vector<4x1x8x256xf32> to vector<4x8x256xf32>
    %57 = arith.maximumf %54, %56 : vector<4x8x256xf32>
    %58 = vector.extract_strided_slice %57 {offsets = [0, 0, 0], sizes = [4, 8, 128], strides = [1, 1, 1]} : vector<4x8x256xf32> to vector<4x8x128xf32>
    %59 = vector.extract_strided_slice %57 {offsets = [0, 0, 128], sizes = [4, 8, 128], strides = [1, 1, 1]} : vector<4x8x256xf32> to vector<4x8x128xf32>
    %60 = arith.maximumf %58, %59 : vector<4x8x128xf32>
    %c0_10 = arith.constant 0 : index
    %c0_11 = arith.constant 0 : index
    %61 = vector.load %arg5[%c0_10, %c0_11] : memref<1x128xf32, #tpu.memory_space<vmem>>, vector<1x128xf32>
    %62 = vector.shape_cast %61 : vector<1x128xf32> to vector<1x1x128xf32>
    %63 = vector.broadcast %62 : vector<1x1x128xf32> to vector<4x8x128xf32>
    %64 = arith.addf %60, %63 : vector<4x8x128xf32>
    %cst_12 = arith.constant 0.000000e+00 : f32
    %65 = vector.broadcast %cst_12 : f32 to vector<4x8x128xf32>
    %66 = arith.maximumf %64, %65 : vector<4x8x128xf32>
    %67 = vector.extract_strided_slice %66 {offsets = [0, 0, 0], sizes = [1, 8, 128], strides = [1, 1, 1]} : vector<4x8x128xf32> to vector<1x8x128xf32>
    %68 = vector.shape_cast %67 : vector<1x8x128xf32> to vector<8x128xf32>
    %69 = vector.extract_strided_slice %66 {offsets = [1, 0, 0], sizes = [1, 8, 128], strides = [1, 1, 1]} : vector<4x8x128xf32> to vector<1x8x128xf32>
    %70 = vector.shape_cast %69 : vector<1x8x128xf32> to vector<8x128xf32>
    %71 = vector.extract_strided_slice %66 {offsets = [2, 0, 0], sizes = [1, 8, 128], strides = [1, 1, 1]} : vector<4x8x128xf32> to vector<1x8x128xf32>
    %72 = vector.shape_cast %71 : vector<1x8x128xf32> to vector<8x128xf32>
    %73 = vector.extract_strided_slice %66 {offsets = [3, 0, 0], sizes = [1, 8, 128], strides = [1, 1, 1]} : vector<4x8x128xf32> to vector<1x8x128xf32>
    %74 = vector.shape_cast %73 : vector<1x8x128xf32> to vector<8x128xf32>
    %75 = tpu.concatenate %68, %70, %72, %74 in 1 : vector<8x128xf32>, vector<8x128xf32>, vector<8x128xf32>, vector<8x128xf32> -> vector<8x512xf32>
    %76 = arith.truncf %75 : vector<8x512xf32> to vector<8x512xbf16>
    %c0_13 = arith.constant 0 : index
    %c0_14 = arith.constant 0 : index
    %77 = vector.load %arg6[%c0_13, %c0_14] : memref<512x128xbf16, #tpu.memory_space<vmem>>, vector<512x128xbf16>
    %cst_15 = arith.constant dense<0.000000e+00> : vector<8x128xf32>
    %78 = tpu.matmul %76, %77, %cst_15 {dimension_numbers = #tpu.dot_dimension_numbers<[1], [0], [0], [1], [0, 0, 1, 1], [], []>} : vector<8x512xbf16>, vector<512x128xbf16>, vector<8x128xf32> -> vector<8x128xf32>
    %c0_16 = arith.constant 0 : index
    %c0_17 = arith.constant 0 : index
    %79 = vector.load %arg7[%c0_16, %c0_17] : memref<1x128xf32, #tpu.memory_space<vmem>>, vector<1x128xf32>
    %80 = vector.broadcast %79 : vector<1x128xf32> to vector<8x128xf32>
    %81 = arith.addf %78, %80 : vector<8x128xf32>
    %cst_18 = arith.constant dense<0xFF800000> : vector<8xf32>
    %82 = vector.multi_reduction <maximumf>, %81, %cst_18 [1] : vector<8x128xf32> to vector<8xf32>
    %83 = vector.shape_cast %82 : vector<8xf32> to vector<8x1xf32>
    %84 = vector.broadcast %83 : vector<8x1xf32> to vector<8x128xf32>
    %85 = arith.subf %81, %84 : vector<8x128xf32>
    %86 = math.exp %85 : vector<8x128xf32>
    %cst_19 = arith.constant dense<0.000000e+00> : vector<8xf32>
    %87 = vector.multi_reduction <add>, %86, %cst_19 [1] : vector<8x128xf32> to vector<8xf32>
    %88 = vector.shape_cast %87 : vector<8xf32> to vector<8x1xf32>
    %89 = math.log %88 : vector<8x1xf32>
    %90 = vector.broadcast %89 : vector<8x1xf32> to vector<8x128xf32>
    %91 = arith.subf %85, %90 : vector<8x128xf32>
    %c0_20 = arith.constant 0 : index
    %c0_21 = arith.constant 0 : index
    %92 = vector.load %arg8[%c0_20, %c0_21] : memref<8x128xf32, #tpu.memory_space<vmem>>, vector<8x128xf32>
    tpu.vector_store %arg8[%c0_20, %c0_21], %91 {strides = array<i32>} : memref<8x128xf32, #tpu.memory_space<vmem>>, vector<8x128xf32>,
    return
  }
  func.func @transform_0(%arg0: i32) -> (i32, i32, i32) {
    %c0_i32 = arith.constant 0 : i32
    %c0_i32_0 = arith.constant 0 : i32
    %c0_i32_1 = arith.constant 0 : i32
    return %c0_i32, %arg0, %c0_i32_0 : i32, i32, i32
  }
  func.func @transform_1(%arg0: i32) -> (i32, i32) {
    %c0_i32 = arith.constant 0 : i32
    %c0_i32_0 = arith.constant 0 : i32
    %c0_i32_1 = arith.constant 0 : i32
    return %c0_i32, %c0_i32_0 : i32, i32
  }
  func.func @transform_2(%arg0: i32) -> (i32, i32) {
    %c0_i32 = arith.constant 0 : i32
    %c0_i32_0 = arith.constant 0 : i32
    %c0_i32_1 = arith.constant 0 : i32
    return %c0_i32, %c0_i32_0 : i32, i32
  }
  func.func @transform_3(%arg0: i32) -> (i32, i32) {
    %c0_i32 = arith.constant 0 : i32
    %c0_i32_0 = arith.constant 0 : i32
    %c0_i32_1 = arith.constant 0 : i32
    return %c0_i32, %c0_i32_0 : i32, i32
  }
  func.func @transform_4(%arg0: i32) -> (i32, i32) {
    %c0_i32 = arith.constant 0 : i32
    %c0_i32_0 = arith.constant 0 : i32
    %c0_i32_1 = arith.constant 0 : i32
    return %c0_i32, %c0_i32_0 : i32, i32
  }
  func.func @transform_5(%arg0: i32) -> (i32, i32) {
    %c0_i32 = arith.constant 0 : i32
    %c0_i32_0 = arith.constant 0 : i32
    %c0_i32_1 = arith.constant 0 : i32
    return %c0_i32, %c0_i32_0 : i32, i32
  }
  func.func @transform_6(%arg0: i32) -> (i32, i32) {
    %c0_i32 = arith.constant 0 : i32
    %c0_i32_0 = arith.constant 0 : i32
    %c0_i32_1 = arith.constant 0 : i32
    return %c0_i32, %c0_i32_0 : i32, i32
  }
  func.func @transform_7(%arg0: i32) -> (i32, i32) {
    %c0_i32 = arith.constant 0 : i32
    %c0_i32_0 = arith.constant 0 : i32
    return %arg0, %c0_i32 : i32, i32
  }
}

</mosaic_0001>

<bundles_post_ra>
// kernel: net_forward.1
= control target key start
LH: loop header
LB: loop body
LE: loop exit
PB: predicated region body
PF: predicated region fallthrough
CT: control target
= control target key end

     0   :  { %12 = vsyncpa [#allocation3], 0  ;;  %s3423_s0 = inlined_call_operand.vmem [shape: f32[28,8,128], index: 0, kind: input, shape index: {}]   ;;  %s3424_s1 = inlined_call_operand.hbm [shape: bf16[640,256], index: 1, kind: input, shape index: {}]   ;;  %s3425_s2 = inlined_call_operand.vmem [shape: f32[1,128], index: 2, kind: input, shape index: {}]   ;;  %s3426_s3 = inlined_call_operand.hbm [shape: bf16[640,256], index: 3, kind: input, shape index: {}]   ;;  %s3427_s4 = inlined_call_operand.vmem [shape: f32[1,128], index: 4, kind: input, shape index: {}]   ;;  %s3428_s5 = inlined_call_operand.vmem [shape: bf16[512,128], index: 5, kind: input, shape index: {}]   ;;  %s3429_s6 = inlined_call_operand.vmem [shape: f32[1,128], index: 6, kind: input, shape index: {}]   ;;  %s3430_s7 = inlined_call_operand.vmem [shape: f32[8,128], index: 7, kind: output, shape index: {}]  }
   0x1   :  { %13 = vsyncpa [#allocation5], 0  ;;  %s2781_s24 = smov [#allocation2]  }
   0x2   :  { %s21_s25 = sshll.u32 %s2781_s24, 4  ;;  %s22_s25 = int_to_ptr.vmem [resolvable:$true] %s21_s25 }
   0x3   :  { %s2745_s26 = scalar_lea.vmem %s22_s25, 10240  ;;  %p2750_p1 = scmp.lt.s32.totalorder %s22_s25, %s22_s25 }
   0x4   :  { %p2746_p0 = scmp.ne.s32.totalorder %s22_s25, %s2745_s26  ;;  %p2751_p2 = scmp.lt.s32.totalorder %s2745_s26, %s2745_s26 }
   0x6   :  { %p2752_p3 = por %p2751_p2, %p2750_p1 }
   0x8   :  { %p2753_p4 = pnand %p2752_p3, %p2746_p0 }
   0xa   :  { %2756 = shalt.err (!%p2753_p4)
}
   0xb   :  { %s2782_s27 = smov 128   ;;  %s2783_s28 = smov 8  }
   0xc   :  { %27 = dma.hbm_to_vmem [thread:$0]  %s3424_s1, 10240, %s22_s25, [#allocation3], %s2782_s27, %s2782_s27, %s2783_s28  }
   0xd   :  { %s2784_s8 = smov [#allocation4]  }
   0xe   :  { %s35_s9 = sshll.u32 %s2784_s8, 4  ;;  %s36_s9 = int_to_ptr.vmem [resolvable:$true] %s35_s9 }
   0xf   :  { %s2765_s10 = scalar_lea.vmem %s36_s9, 10240  ;;  %p2770_p6 = scmp.lt.s32.totalorder %s36_s9, %s36_s9 }
  0x10   :  { %p2766_p5 = scmp.ne.s32.totalorder %s36_s9, %s2765_s10  ;;  %p2771_p7 = scmp.lt.s32.totalorder %s2765_s10, %s2765_s10 }
  0x12   :  { %p2772_p8 = por %p2771_p7, %p2770_p6 }
  0x14   :  { %p2773_p9 = pnand %p2772_p8, %p2766_p5 }
  0x16   :  { %2776 = shalt.err (!%p2773_p9)
}
  0x17   :  { %41 = dma.hbm_to_vmem [thread:$0]  %s3426_s3, 10240, %s36_s9, [#allocation5], %s2782_s27, %s2782_s27, %s2783_s28  }
  0x18   :  { %2777 = dma.done.wait [#allocation3], 10240  }
  0x19   :  { %2778 = vsyncadd [#allocation3], 4294957056 }
  0x1a   :  { %2779 = dma.done.wait [#allocation5], 10240  }
  0x1b   :  { %2780 = vsyncadd [#allocation5], 4294957056  ;;  %v2461_v0 = vld [vmem:[#allocation2 + $0x74] ss:$8 sps:$4 sm:$0xff]   ;;  %v2465_v2 = vld [vmem:[#allocation2 + $0x70] ss:$8 sps:$4 sm:$0xff]  }
  0x1c   :  { %v2463_v1 = vld [vmem:[#allocation2 + $0x174] ss:$8 sps:$4 sm:$0xff]   ;;  %590 = vmatprep.subr.bf16.mxu0 %v2461_v0  ;;  %v2466_v3 = vld [vmem:[#allocation2 + $0x170] ss:$8 sps:$4 sm:$0xff]   ;;  %v2467_v4 = vld [vmem:[#allocation2 + $0x64] ss:$8 sps:$4 sm:$0xff]  }
  0x1d   :  { %743 = vmatprep.subr.bf16.mxu1 %v2463_v1  ;;  %591 = vmatpush1.bf16.msra.mxu0 %v2465_v2  ;;  %v2469_v5 = vld [vmem:[#allocation2 + $0x164] ss:$8 sps:$4 sm:$0xff]   ;;  %v2471_v6 = vld [vmem:[#allocation2 + $0x60] ss:$8 sps:$4 sm:$0xff]   ;;  %v2473_v8 = vld [vmem:[#allocation2 + $0x54] ss:$8 sps:$4 sm:$0xff]  }
  0x1e   :  { %744 = vmatpush1.bf16.msra.mxu1 %v2466_v3  ;;  %592 = vmatprep.subr.bf16.mxu0 %v2467_v4  ;;  %v2472_v7 = vld [vmem:[#allocation2 + $0x160] ss:$8 sps:$4 sm:$0xff]   ;;  %v2475_v9 = vld [vmem:[#allocation2 + $0x154] ss:$8 sps:$4 sm:$0xff]   ;;  %v2477_v10 = vld [vmem:[#allocation2 + $0x50] ss:$8 sps:$4 sm:$0xff]  }
  0x1f   :  { %745 = vmatprep.subr.bf16.mxu1 %v2469_v5  ;;  %v2478_v11 = vld [vmem:[#allocation2 + $0x150] ss:$8 sps:$4 sm:$0xff]   ;;  %v2479_v12 = vld [vmem:[#allocation2 + $0x44] ss:$8 sps:$4 sm:$0xff]   ;;  %v2483_v14 = vld [vmem:[#allocation2 + $0x40] ss:$8 sps:$4 sm:$0xff]  }
  0x20   :  { %v2481_v13 = vld [vmem:[#allocation2 + $0x144] ss:$8 sps:$4 sm:$0xff]   ;;  %v2484_v15 = vld [vmem:[#allocation2 + $0x140] ss:$8 sps:$4 sm:$0xff]   ;;  %v2485_v16 = vld [vmem:[#allocation2 + $0x34] ss:$8 sps:$4 sm:$0xff]  }
  0x21   :  { %593 = vmatpush1.bf16.msra.mxu0 %v2471_v6  ;;  %v2487_v17 = vld [vmem:[#allocation2 + $0x134] ss:$8 sps:$4 sm:$0xff]   ;;  %v2489_v18 = vld [vmem:[#allocation2 + $0x30] ss:$8 sps:$4 sm:$0xff]   ;;  %v2491_v20 = vld [vmem:[#allocation2 + $0x24] ss:$8 sps:$4 sm:$0xff]  }
  0x22   :  { %746 = vmatpush1.bf16.msra.mxu1 %v2472_v7  ;;  %594 = vmatprep.subr.bf16.mxu0 %v2473_v8  ;;  %v2490_v19 = vld [vmem:[#allocation2 + $0x130] ss:$8 sps:$4 sm:$0xff]   ;;  %v2493_v21 = vld [vmem:[#allocation2 + $0x124] ss:$8 sps:$4 sm:$0xff]   ;;  %v2495_v22 = vld [vmem:[#allocation2 + $0x20] ss:$8 sps:$4 sm:$0xff]  }
  0x23   :  { %747 = vmatprep.subr.bf16.mxu1 %v2475_v9  ;;  %v2496_v23 = vld [vmem:[#allocation2 + $0x120] ss:$8 sps:$4 sm:$0xff]   ;;  %v2497_v24 = vld [vmem:[#allocation2 + $0x14] ss:$8 sps:$4 sm:$0xff]   ;;  %v2501_v26 = vld [vmem:[#allocation2 + $0x10] ss:$8 sps:$4 sm:$0xff]  }
  0x24   :  { %v2499_v25 = vld [vmem:[#allocation2 + $0x114] ss:$8 sps:$4 sm:$0xff]   ;;  %v2502_v27 = vld [vmem:[#allocation2 + $0x110] ss:$8 sps:$4 sm:$0xff]   ;;  %v2503_v28 = vld [vmem:[#allocation2 + $0x4] ss:$8 sps:$4 sm:$0xff]  }
  0x25   :  { %595 = vmatpush1.bf16.msra.mxu0 %v2477_v10  ;;  %v2505_v29 = vld [vmem:[#allocation2 + $0x104] ss:$8 sps:$4 sm:$0xff]   ;;  %v2507_v30 = vld [vmem:[#allocation2] ss:$8 sps:$4 sm:$0xff]   ;;  %v2509_v32 = vld [vmem:[#allocation2 + $0xf4] ss:$8 sps:$4 sm:$0xff]  }
  0x26   :  { %748 = vmatpush1.bf16.msra.mxu1 %v2478_v11  ;;  %596 = vmatprep.subr.bf16.mxu0 %v2479_v12  ;;  %v2508_v31 = vld [vmem:[#allocation2 + $0x100] ss:$8 sps:$4 sm:$0xff]   ;;  %v2511_v33 = vld [vmem:[#allocation2 + $0x1f4] ss:$8 sps:$4 sm:$0xff]   ;;  %v2513_v34 = vld [vmem:[#allocation2 + $0xf0] ss:$8 sps:$4 sm:$0xff]  }
  0x27   :  { %749 = vmatprep.subr.bf16.mxu1 %v2481_v13  ;;  %v2514_v35 = vld [vmem:[#allocation2 + $0x1f0] ss:$8 sps:$4 sm:$0xff]   ;;  %v2515_v36 = vld [vmem:[#allocation2 + $0xe4] ss:$8 sps:$4 sm:$0xff]   ;;  %v2519_v38 = vld [vmem:[#allocation2 + $0xe0] ss:$8 sps:$4 sm:$0xff]  }
  0x28   :  { %v2517_v37 = vld [vmem:[#allocation2 + $0x1e4] ss:$8 sps:$4 sm:$0xff]   ;;  %v2520_v39 = vld [vmem:[#allocation2 + $0x1e0] ss:$8 sps:$4 sm:$0xff]   ;;  %v2521_v40 = vld [vmem:[#allocation2 + $0xd4] ss:$8 sps:$4 sm:$0xff]  }
  0x29   :  { %597 = vmatpush1.bf16.msra.mxu0 %v2483_v14  ;;  %v2523_v41 = vld [vmem:[#allocation2 + $0x1d4] ss:$8 sps:$4 sm:$0xff]   ;;  %v2525_v42 = vld [vmem:[#allocation2 + $0xd0] ss:$8 sps:$4 sm:$0xff]   ;;  %v2527_v44 = vld [vmem:[#allocation2 + $0xc4] ss:$8 sps:$4 sm:$0xff]  }
  0x2a   :  { %750 = vmatpush1.bf16.msra.mxu1 %v2484_v15  ;;  %598 = vmatprep.subr.bf16.mxu0 %v2485_v16  ;;  %v2526_v43 = vld [vmem:[#allocation2 + $0x1d0] ss:$8 sps:$4 sm:$0xff]   ;;  %v2529_v45 = vld [vmem:[#allocation2 + $0x1c4] ss:$8 sps:$4 sm:$0xff]   ;;  %v2531_v46 = vld [vmem:[#allocation2 + $0xc0] ss:$8 sps:$4 sm:$0xff]  }
  0x2b   :  { %751 = vmatprep.subr.bf16.mxu1 %v2487_v17  ;;  %v56_v47 = vld [vmem:[%s3423_s0 + $0x8] sm:$0xff]  ;;  %v57_v48 = vld [vmem:[%s3423_s0 + $0x10] sm:$0xff]  ;;  %v58_v49 = vld [vmem:[%s3423_s0 + $0x18] sm:$0xff] }
  0x2c   :  { %v2532_v50 = vld [vmem:[#allocation2 + $0x1c0] ss:$8 sps:$4 sm:$0xff]   ;;  %v95_v51 = vpack.c.bf16 %v57_v48, %v56_v47  ;;  %v2533_v53 = vld [vmem:[#allocation2 + $0xb4] ss:$8 sps:$4 sm:$0xff]   ;;  %v2537_v56 = vld [vmem:[#allocation2 + $0xb0] ss:$8 sps:$4 sm:$0xff]   ;;  %v84_v12 = vpack.c.bf16 %v58_v49, %v57_v48 }
  0x2d   :  { %599 = vmatpush1.bf16.msra.mxu0 %v2489_v18  ;;  %v59_v52 = vld [vmem:[%s3423_s0 + $0x20] sm:$0xff]  ;;  %v2535_v54 = vld [vmem:[#allocation2 + $0x1b4] ss:$8 sps:$4 sm:$0xff]   ;;  %v2538_v57 = vld [vmem:[#allocation2 + $0x1b0] ss:$8 sps:$4 sm:$0xff]  }
  0x2e   :  { %752 = vmatpush1.bf16.msra.mxu1 %v2490_v19  ;;  %600 = vmatprep.subr.bf16.mxu0 %v2491_v20  ;;  %v96_v55 = vpack.c.bf16 %v59_v52, %v58_v49  ;;  %v2539_v58 = vld [vmem:[#allocation2 + $0xa4] ss:$8 sps:$4 sm:$0xff]   ;;  %v2543_v60 = vld [vmem:[#allocation2 + $0xa0] ss:$8 sps:$4 sm:$0xff]   ;;  %v2545_v62 = vld [vmem:[#allocation2 + $0x94] ss:$8 sps:$4 sm:$0xff]  }
  0x2f   :  { %753 = vmatprep.subr.bf16.mxu1 %v2493_v21  ;;  %622 = vmatprep.mubr.bf16.mxu0 %v95_v51  ;;  %v2541_v59 = vld [vmem:[#allocation2 + $0x1a4] ss:$8 sps:$4 sm:$0xff]   ;;  %v2544_v61 = vld [vmem:[#allocation2 + $0x1a0] ss:$8 sps:$4 sm:$0xff]   ;;  %v2547_v63 = vld [vmem:[#allocation2 + $0x194] ss:$8 sps:$4 sm:$0xff]  }
  0x30   :  { %775 = vmatprep.mubr.bf16.mxu1 %v96_v55  ;;  %v2549_v0 = vld [vmem:[#allocation2 + $0x90] ss:$8 sps:$4 sm:$0xff]   ;;  %v2551_v2 = vld [vmem:[#allocation2 + $0x84] ss:$8 sps:$4 sm:$0xff]   ;;  %v2555_v4 = vld [vmem:[#allocation2 + $0x80] ss:$8 sps:$4 sm:$0xff]  }
  0x31   :  { %601 = vmatpush1.bf16.msra.mxu0 %v2495_v22  ;;  %v2550_v1 = vld [vmem:[#allocation2 + $0x190] ss:$8 sps:$4 sm:$0xff]   ;;  %v2553_v3 = vld [vmem:[#allocation2 + $0x184] ss:$8 sps:$4 sm:$0xff]   ;;  %v2556_v5 = vld [vmem:[#allocation2 + $0x180] ss:$8 sps:$4 sm:$0xff]  }
  0x32   :  { %754 = vmatpush1.bf16.msra.mxu1 %v2496_v23  ;;  %602 = vmatprep.subr.bf16.mxu0 %v2497_v24  ;;  %v55_v6 = vld [vmem:[%s3423_s0] sm:$0xff]  ;;  %v60_v7 = vld [vmem:[%s3423_s0 + $0x28] sm:$0xff]  ;;  %v2559_v8 = vld [vmem:[#allocation2 + $0x274] ss:$8 sps:$4 sm:$0xff]  }
  0x33   :  { %755 = vmatprep.subr.bf16.mxu1 %v2499_v25  ;;  %v2557_v9 = vld [vmem:[#allocation2 + $0x270] ss:$8 sps:$4 sm:$0xff]   ;;  %v83_v11 = vpack.c.bf16 %v56_v47, %v55_v6  ;;  %v2562_v13 = vld [vmem:[#allocation2 + $0x264] ss:$8 sps:$4 sm:$0xff]   ;;  %v2560_v15 = vld [vmem:[#allocation2 + $0x260] ss:$8 sps:$4 sm:$0xff]   ;;  %v2859_v19 = vpack.c.bf16 %v60_v7, %v59_v52 }
  0x34   :  { %v61_v10 = vld [vmem:[%s3423_s0 + $0x30] sm:$0xff]  ;;  %v62_v16 = vld [vmem:[%s3423_s0 + $0x38] sm:$0xff]  ;;  %v63_v17 = vld [vmem:[%s3423_s0 + $0x40] sm:$0xff] }
  0x35   :  { %603 = vmatpush1.bf16.msra.mxu0 %v2501_v26  ;;  %v97_v14 = vpack.c.bf16 %v61_v10, %v60_v7  ;;  %v2565_v18 = vld [vmem:[#allocation2 + $0x254] ss:$8 sps:$4 sm:$0xff]   ;;  %v2563_v20 = vld [vmem:[#allocation2 + $0x250] ss:$8 sps:$4 sm:$0xff]   ;;  %v98_v21 = vpack.c.bf16 %v63_v17, %v62_v16  ;;  %v2568_v22 = vld [vmem:[#allocation2 + $0x244] ss:$8 sps:$4 sm:$0xff]  }
  0x36   :  { %756 = vmatpush1.bf16.msra.mxu1 %v2502_v27  ;;  %604 = vmatprep.subr.bf16.mxu0 %v2503_v28  ;;  %v64_v23 = vld [vmem:[%s3423_s0 + $0x48] sm:$0xff]  ;;  %v65_v24 = vld [vmem:[%s3423_s0 + $0x50] sm:$0xff]  ;;  %v2868_v27 = vpack.c.bf16 %v62_v16, %v61_v10  ;;  %v74_v52 = vld [vmem:[%s3423_s0 + $0x98] sm:$0xff] }
  0x37   :  { %757 = vmatprep.subr.bf16.mxu1 %v2505_v29  ;;  %v2566_v25 = vld [vmem:[#allocation2 + $0x240] ss:$8 sps:$4 sm:$0xff]   ;;  %v2571_v26 = vld [vmem:[#allocation2 + $0x234] ss:$8 sps:$4 sm:$0xff]   ;;  %v2569_v28 = vld [vmem:[#allocation2 + $0x230] ss:$8 sps:$4 sm:$0xff]   ;;  %v99_v29 = vpack.c.bf16 %v65_v24, %v64_v23 }
  0x38   :  { %v72_v48 = vld [vmem:[%s3423_s0 + $0x88] sm:$0xff]  ;;  %v73_v49 = vld [vmem:[%s3423_s0 + $0x90] sm:$0xff] }
  0x39   :  { %605 = vmatpush1.bf16.msra.mxu0 %v2507_v30  ;;  %v2574_v30 = vld [vmem:[#allocation2 + $0x224] ss:$8 sps:$4 sm:$0xff]   ;;  %v103_v51 = vpack.c.bf16 %v73_v49, %v72_v48  ;;  %v2581_v6 = vld [vmem:[#allocation4 + $0x70] ss:$8 sps:$4 sm:$0xff]   ;;  %v2583_v7 = vld [vmem:[#allocation4 + $0x74] ss:$8 sps:$4 sm:$0xff]  }
  0x3a   :  { %758 = vmatpush1.bf16.msra.mxu1 %v2508_v31  ;;  %606 = vmatprep.subr.bf16.mxu0 %v2509_v32  ;;  %v66_v31 = vld [vmem:[%s3423_s0 + $0x58] sm:$0xff]  ;;  %v67_v32 = vld [vmem:[%s3423_s0 + $0x60] sm:$0xff] }
  0x3b   :  { %759 = vmatprep.subr.bf16.mxu1 %v2511_v33  ;;  %v2572_v33 = vld [vmem:[#allocation2 + $0x220] ss:$8 sps:$4 sm:$0xff]   ;;  %v2587_v10 = vld [vmem:[#allocation4 + $0x50] ss:$8 sps:$4 sm:$0xff]  }
  0x3c   :  { %v2596_v16 = vld [vmem:[#allocation4 + $0x20] ss:$8 sps:$4 sm:$0xff]  }
  0x3d   :  { %607 = vmatpush2.bf16.msra.mxu0 %v2513_v34  ;;  %v2577_v34 = vld [vmem:[#allocation2 + $0x214] ss:$8 sps:$4 sm:$0xff]  }
  0x3e   :  { %760 = vmatpush2.bf16.msra.mxu1 %v2514_v35  ;;  %608 = vmatprep.subr.bf16.mxu0 %v2515_v36  ;;  %v2878_v35 = vpack.c.bf16 %v64_v23, %v63_v17  ;;  %v2575_v36 = vld [vmem:[#allocation2 + $0x210] ss:$8 sps:$4 sm:$0xff]   ;;  %v2598_v17 = vld [vmem:[#allocation4 + $0x24] ss:$8 sps:$4 sm:$0xff]   ;;  %v2607_v23 = vld [vmem:[#allocation4 + $0xf4] ss:$8 sps:$4 sm:$0xff]  }
  0x3f   :  { %761 = vmatprep.subr.bf16.mxu1 %v2517_v37  ;;  %v100_v37 = vpack.c.bf16 %v67_v32, %v66_v31 }
  0x41   :  { %609 = vmatpush2.bf16.msra.mxu0 %v2519_v38  ;;  %v2580_v38 = vld [vmem:[#allocation2 + $0x204] ss:$8 sps:$4 sm:$0xff]  }
  0x42   :  { %762 = vmatpush2.bf16.msra.mxu1 %v2520_v39  ;;  %610 = vmatprep.subr.bf16.mxu0 %v2521_v40  ;;  %v68_v39 = vld [vmem:[%s3423_s0 + $0x68] sm:$0xff]  ;;  %v69_v40 = vld [vmem:[%s3423_s0 + $0x70] sm:$0xff] }
  0x43   :  { %763 = vmatprep.subr.bf16.mxu1 %v2523_v41  ;;  %v2578_v41 = vld [vmem:[#allocation2 + $0x200] ss:$8 sps:$4 sm:$0xff]  }
  0x45   :  { %611 = vmatpush2.bf16.msra.mxu0 %v2525_v42  ;;  %v2888_v42 = vpack.c.bf16 %v66_v31, %v65_v24  ;;  %v2608_v24 = vld [vmem:[#allocation4 + $0xe0] ss:$8 sps:$4 sm:$0xff]  }
  0x46   :  { %764 = vmatpush2.bf16.msra.mxu1 %v2526_v43  ;;  %612 = vmatprep.subr.bf16.mxu0 %v2527_v44  ;;  %v101_v43 = vpack.c.bf16 %v69_v40, %v68_v39  ;;  %v70_v44 = vld [vmem:[%s3423_s0 + $0x78] sm:$0xff]  ;;  %v2617_v31 = vld [vmem:[#allocation4 + $0xc0] ss:$8 sps:$4 sm:$0xff]  }
  0x47   :  { %765 = vmatprep.subr.bf16.mxu1 %v2529_v45  ;;  %v71_v45 = vld [vmem:[%s3423_s0 + $0x80] sm:$0xff] }
  0x48   :  { %v102_v47 = vpack.c.bf16 %v71_v45, %v70_v44 }
  0x49   :  { %613 = vmatpush2.bf16.msra.mxu0 %v2531_v46  ;;  %v2898_v46 = vpack.c.bf16 %v68_v39, %v67_v32  ;;  %v2622_v32 = vld [vmem:[#allocation4 + $0xb4] ss:$8 sps:$4 sm:$0xff]   ;;  %v2628_v39 = vld [vmem:[#allocation4 + $0xa4] ss:$8 sps:$4 sm:$0xff]  }
  0x4a   :  { %766 = vmatpush2.bf16.msra.mxu1 %v2532_v50  ;;  %614 = vmatprep.subr.bf16.mxu0 %v2533_v53  ;;  %v2908_v50 = vpack.c.bf16 %v70_v44, %v69_v40  ;;  %v75_v53 = vld [vmem:[%s3423_s0 + $0xa0] sm:$0xff]  ;;  %v2631_v40 = vld [vmem:[#allocation4 + $0x94] ss:$8 sps:$4 sm:$0xff]   ;;  %v2632_v44 = vld [vmem:[#allocation4 + $0x250] ss:$8 sps:$4 sm:$0xff]  }
  0x4b   :  { %767 = vmatprep.subr.bf16.mxu1 %v2535_v54  ;;  %v2918_v54 = vpack.c.bf16 %v72_v48, %v71_v45  ;;  %v2634_v45 = vld [vmem:[#allocation4 + $0x254] ss:$8 sps:$4 sm:$0xff]  }
  0x4c   :  { %v2640_v48 = vld [vmem:[#allocation4 + $0x174] ss:$8 sps:$4 sm:$0xff]  }
  0x4d   :  { %615 = vmatpush2.bf16.msra.mxu0 %v2537_v56  ;;  %v76_v56 = vld [vmem:[%s3423_s0 + $0xa8] sm:$0xff] }
  0x4e   :  { %768 = vmatpush2.bf16.msra.mxu1 %v2538_v57  ;;  %616 = vmatprep.subr.bf16.mxu0 %v2539_v58  ;;  %v77_v57 = vld [vmem:[%s3423_s0 + $0xb0] sm:$0xff]  ;;  %v2928_v58 = vpack.c.bf16 %v74_v52, %v73_v49 }
  0x4f   :  { %769 = vmatprep.subr.bf16.mxu1 %v2541_v59  ;;  %v105_v59 = vpack.c.bf16 %v77_v57, %v76_v56 }
  0x51   :  { %617 = vmatpush2.bf16.msra.mxu0 %v2543_v60  ;;  %v78_v60 = vld [vmem:[%s3423_s0 + $0xb8] sm:$0xff] }
  0x52   :  { %770 = vmatpush2.bf16.msra.mxu1 %v2544_v61  ;;  %618 = vmatprep.subr.bf16.mxu0 %v2545_v62  ;;  %v79_v61 = vld [vmem:[%s3423_s0 + $0xc0] sm:$0xff]  ;;  %v2938_v62 = vpack.c.bf16 %v76_v56, %v75_v53 }
  0x53   :  { %771 = vmatprep.subr.bf16.mxu1 %v2547_v63  ;;  %v106_v63 = vpack.c.bf16 %v79_v61, %v78_v60 }
  0x55   :  { %619 = vmatpush2.bf16.msra.mxu0 %v2549_v0  ;;  %v80_v0 = vld [vmem:[%s3423_s0 + $0xc8] sm:$0xff] }
  0x56   :  { %772 = vmatpush2.bf16.msra.mxu1 %v2550_v1  ;;  %620 = vmatprep.subr.bf16.mxu0 %v2551_v2  ;;  %v2948_v1 = vld [vmem:[%s3423_s0 + $0xd0] sm:$0xff]  ;;  %v2950_v2 = vpack.c.bf16 %v78_v60, %v77_v57 }
  0x57   :  { %773 = vmatprep.subr.bf16.mxu1 %v2553_v3  ;;  %v108_v3 = vpack.c.bf16 %v2948_v1, %v80_v0  ;;  %v2650_v60 = vld [vmem:[#allocation4 + $0x230] ss:$8 sps:$4 sm:$0xff]  }
  0x59   :  { %621 = vmatpush2.bf16.msra.mxu0 %v2555_v4  ;;  %v2955_v4 = vpack.c.bf16 %v80_v0, %v79_v61  ;;  %v2658_v0 = vld [vmem:[#allocation4 + $0x224] ss:$8 sps:$4 sm:$0xff]  }
  0x5a   :  { %774 = vmatpush2.bf16.msra.mxu1 %v2556_v5  ;;  %896 = vmatprep.subr.bf16.mxu0 %v2559_v8  ;;  %v3431_v5 = vmov 0   ;;  %v2584_v8 = vld [vmem:[#allocation4 + $0x60] ss:$8 sps:$4 sm:$0xff]  }
  0x5b   :  { %1607 = vmatprep.subr.bf16.mxu1 %v2583_v7  ;;  %v2662_v7 = vld [vmem:[#allocation4 + $0x210] ss:$8 sps:$4 sm:$0xff]  }
  0x5c   :  { %623 = vmatmul.mubr.bf16.vlgmr.msra.gmra.mxu0 %v83_v11  ;;  %v2589_v11 = vld [vmem:[#allocation4 + $0x54] ss:$8 sps:$4 sm:$0xff]  }
  0x5d   :  { %776 = vmatmul.mubr.bf16.vlgmr.msra.gmra.mxu1 %v84_v12  ;;  %897 = vmatpush1.bf16.msra.mxu0 %v2557_v9  ;;  %v2586_v9 = vld [vmem:[#allocation4 + $0x64] ss:$8 sps:$4 sm:$0xff]  }
  0x5e   :  { %632 = vmatprep.mubr.bf16.mxu0 %v96_v55  ;;  %785 = vmatprep.mubr.bf16.mxu1 %v97_v14  ;;  %v104_v55 = vpack.c.bf16 %v75_v53, %v74_v52 }
  0x5f   :  { %898 = vmatprep.subr.bf16.mxu0 %v2562_v13  ;;  %1608 = vmatpush1.bf16.msra.mxu1 %v2581_v6  ;;  %v2592_v13 = vld [vmem:[#allocation4 + $0x44] ss:$8 sps:$4 sm:$0xff]   ;;  %v2664_v6 = vld [vmem:[#allocation4 + $0x214] ss:$8 sps:$4 sm:$0xff]  }
  0x60   :  { %1609 = vmatprep.subr.bf16.mxu1 %v2586_v9 }
  0x61   :  { %899 = vmatpush1.bf16.msra.mxu0 %v2560_v15  ;;  %v2595_v15 = vld [vmem:[#allocation4 + $0x34] ss:$8 sps:$4 sm:$0xff]  }
  0x62   :  { %900 = vmatprep.subr.bf16.mxu0 %v2565_v18  ;;  %v2599_v18 = vld [vmem:[#allocation4 + $0x10] ss:$8 sps:$4 sm:$0xff]  }
  0x63   :  { %1610 = vmatpush1.bf16.msra.mxu1 %v2584_v8 }
  0x64   :  { %633 = vmatmul.mubr.bf16.gmra.mxu0 %v84_v12  ;;  %1611 = vmatprep.subr.bf16.mxu1 %v2589_v11  ;;  %v2590_v12 = vld [vmem:[#allocation4 + $0x40] ss:$8 sps:$4 sm:$0xff]   ;;  %v2670_v11 = vld [vmem:[#allocation4 + $0x204] ss:$8 sps:$4 sm:$0xff]  }
  0x65   :  { %786 = vmatmul.mubr.bf16.gmra.mxu1 %v2859_v19  ;;  %642 = vmatprep.mubr.bf16.mxu0 %v97_v14  ;;  %v2593_v14 = vld [vmem:[#allocation4 + $0x30] ss:$8 sps:$4 sm:$0xff]  }
  0x66   :  { %795 = vmatprep.mubr.bf16.mxu1 %v98_v21  ;;  %901 = vmatpush1.bf16.msra.mxu0 %v2563_v20  ;;  %v2602_v20 = vld [vmem:[#allocation4] ss:$8 sps:$4 sm:$0xff]  }
  0x67   :  { %902 = vmatprep.subr.bf16.mxu0 %v2568_v22  ;;  %1612 = vmatpush1.bf16.msra.mxu1 %v2587_v10  ;;  %v2605_v22 = vld [vmem:[#allocation4 + $0xf0] ss:$8 sps:$4 sm:$0xff]  }
  0x68   :  { %1613 = vmatprep.subr.bf16.mxu1 %v2592_v13 }
  0x6a   :  { %903 = vmatpush1.bf16.msra.mxu0 %v2566_v25  ;;  %v2610_v25 = vld [vmem:[#allocation4 + $0xe4] ss:$8 sps:$4 sm:$0xff]  }
  0x6b   :  { %904 = vmatprep.subr.bf16.mxu0 %v2571_v26  ;;  %1614 = vmatpush1.bf16.msra.mxu1 %v2590_v12  ;;  %v2611_v26 = vld [vmem:[#allocation4 + $0xd0] ss:$8 sps:$4 sm:$0xff]   ;;  %v2668_v12 = vld [vmem:[#allocation4 + $0x200] ss:$8 sps:$4 sm:$0xff]  }
  0x6c   :  { %643 = vmatmul.mubr.bf16.gmra.mxu0 %v2859_v19  ;;  %1615 = vmatprep.subr.bf16.mxu1 %v2595_v15 }
  0x6d   :  { %796 = vmatmul.mubr.bf16.gmra.mxu1 %v2868_v27  ;;  %652 = vmatprep.mubr.bf16.mxu0 %v98_v21  ;;  %v2604_v21 = vld [vmem:[#allocation4 + $0x4] ss:$8 sps:$4 sm:$0xff]  }
  0x6e   :  { %805 = vmatprep.mubr.bf16.mxu1 %v99_v29  ;;  %905 = vmatpush1.bf16.msra.mxu0 %v2569_v28  ;;  %v2614_v28 = vld [vmem:[#allocation4 + $0x270] ss:$8 sps:$4 sm:$0xff]  }
  0x6f   :  { %906 = vmatprep.subr.bf16.mxu0 %v2574_v30  ;;  %1616 = vmatpush1.bf16.msra.mxu1 %v2593_v14  ;;  %v2619_v30 = vld [vmem:[#allocation4 + $0xc4] ss:$8 sps:$4 sm:$0xff]  }
  0x70   :  { %1617 = vmatprep.subr.bf16.mxu1 %v2598_v17 }
  0x72   :  { %907 = vmatpush1.bf16.msra.mxu0 %v2572_v33  ;;  %v2620_v33 = vld [vmem:[#allocation4 + $0xb0] ss:$8 sps:$4 sm:$0xff]  }
  0x73   :  { %908 = vmatprep.subr.bf16.mxu0 %v2577_v34  ;;  %1618 = vmatpush1.bf16.msra.mxu1 %v2596_v16  ;;  %v82_v34 = vld [vmem:[%s3423_s0 + $0xd8] sm:$0xff] }
  0x74   :  { %653 = vmatmul.mubr.bf16.gmra.mxu0 %v2868_v27 }
  0x75   :  { %806 = vmatmul.mubr.bf16.gmra.mxu1 %v2878_v35  ;;  %662 = vmatprep.mubr.bf16.mxu0 %v99_v29  ;;  %v2616_v29 = vld [vmem:[#allocation4 + $0x274] ss:$8 sps:$4 sm:$0xff]  }
  0x76   :  { %815 = vmatprep.mubr.bf16.mxu1 %v100_v37  ;;  %909 = vmatpush1.bf16.msra.mxu0 %v2575_v36  ;;  %v2625_v36 = vld [vmem:[#allocation4 + $0x264] ss:$8 sps:$4 sm:$0xff]  }
  0x77   :  { %910 = vmatprep.subr.bf16.mxu0 %v2580_v38  ;;  %v2626_v38 = vld [vmem:[#allocation4 + $0xa0] ss:$8 sps:$4 sm:$0xff]  }
  0x7a   :  { %911 = vmatpush1.bf16.msra.mxu0 %v2578_v41  ;;  %v2629_v41 = vld [vmem:[#allocation4 + $0x90] ss:$8 sps:$4 sm:$0xff]  }
  0x7b   :  { %1753 = vmatprep.subr.bf16.mxu0 %v2616_v29 }
  0x7c   :  { %663 = vmatmul.mubr.bf16.gmra.mxu0 %v2878_v35 }
  0x7d   :  { %816 = vmatmul.mubr.bf16.gmra.mxu1 %v2888_v42  ;;  %672 = vmatprep.mubr.bf16.mxu0 %v100_v37  ;;  %v109_v37 = vpack.c.bf16 %v82_v34, %v2948_v1  ;;  %v2656_v1 = vld [vmem:[#allocation4 + $0x220] ss:$8 sps:$4 sm:$0xff]  }
  0x7e   :  { %825 = vmatprep.mubr.bf16.mxu1 %v101_v43 }
  0x84   :  { %673 = vmatmul.mubr.bf16.gmra.mxu0 %v2888_v42 }
  0x85   :  { %826 = vmatmul.mubr.bf16.gmra.mxu1 %v2898_v46  ;;  %682 = vmatprep.mubr.bf16.mxu0 %v101_v43  ;;  %v2635_v43 = vld [vmem:[#allocation4 + $0x80] ss:$8 sps:$4 sm:$0xff]  }
  0x86   :  { %835 = vmatprep.mubr.bf16.mxu1 %v102_v47 }
  0x8c   :  { %683 = vmatmul.mubr.bf16.gmra.mxu0 %v2898_v46 }
  0x8d   :  { %836 = vmatmul.mubr.bf16.gmra.mxu1 %v2908_v50  ;;  %692 = vmatprep.mubr.bf16.mxu0 %v102_v47 }
  0x8e   :  { %845 = vmatprep.mubr.bf16.mxu1 %v103_v51 }
  0x94   :  { %693 = vmatmul.mubr.bf16.gmra.mxu0 %v2908_v50 }
  0x95   :  { %846 = vmatmul.mubr.bf16.gmra.mxu1 %v2918_v54  ;;  %702 = vmatprep.mubr.bf16.mxu0 %v103_v51 }
  0x96   :  { %855 = vmatprep.mubr.bf16.mxu1 %v104_v55 }
  0x9c   :  { %703 = vmatmul.mubr.bf16.gmra.mxu0 %v2918_v54 }
  0x9d   :  { %856 = vmatmul.mubr.bf16.gmra.mxu1 %v2928_v58  ;;  %712 = vmatprep.mubr.bf16.mxu0 %v104_v55  ;;  %v2644_v55 = vld [vmem:[#allocation4 + $0x240] ss:$8 sps:$4 sm:$0xff]  }
  0x9e   :  { %865 = vmatprep.mubr.bf16.mxu1 %v105_v59 }
  0xa4   :  { %713 = vmatmul.mubr.bf16.gmra.mxu0 %v2928_v58 }
  0xa5   :  { %866 = vmatmul.mubr.bf16.gmra.mxu1 %v2938_v62  ;;  %722 = vmatprep.mubr.bf16.mxu0 %v105_v59  ;;  %v2652_v59 = vld [vmem:[#allocation4 + $0x234] ss:$8 sps:$4 sm:$0xff]  }
  0xa6   :  { %875 = vmatprep.mubr.bf16.mxu1 %v106_v63 }
  0xac   :  { %723 = vmatmul.mubr.bf16.gmra.mxu0 %v2938_v62 }
  0xad   :  { %876 = vmatmul.mubr.bf16.gmra.mxu1 %v2950_v2  ;;  %732 = vmatprep.mubr.bf16.mxu0 %v106_v63 }
  0xae   :  { %885 = vmatprep.mubr.bf16.mxu1 %v108_v3 }
  0xb4   :  { %733 = vmatmul.mubr.bf16.gmra.mxu0 %v2950_v2 }
  0xb5   :  { %886 = vmatmul.mubr.bf16.gmra.mxu1 %v2955_v4  ;;  %928 = vmatprep.mubr.bf16.mxu0 %v3431_v5 }
  0xbc   :  { %929 = vmatmul.mubr.bf16.vlgmr.msra.gmra.mxu0 %v2859_v19  ;;  %v2601_v19 = vld [vmem:[#allocation4 + $0x14] ss:$8 sps:$4 sm:$0xff]  }
  0xbd   :  { %938 = vmatprep.mubr.bf16.mxu0 %v3431_v5  ;;  %1619 = vmatprep.subr.bf16.mxu1 %v2601_v19 }
  0xbe   :  { %1620 = vmatpush1.bf16.msra.mxu1 %v2599_v18  ;;  %1754 = vmatpush1.bf16.msra.mxu0 %v2614_v28 }
  0xbf   :  { %1621 = vmatprep.subr.bf16.mxu1 %v2604_v21  ;;  %1755 = vmatprep.subr.bf16.mxu0 %v2625_v36 }
  0xc2   :  { %1622 = vmatpush1.bf16.msra.mxu1 %v2602_v20 }
  0xc3   :  { %1623 = vmatprep.subr.bf16.mxu1 %v2607_v23 }
  0xc4   :  { %939 = vmatmul.mubr.bf16.gmra.mxu0 %v2868_v27  ;;  %v2613_v27 = vld [vmem:[#allocation4 + $0xd4] ss:$8 sps:$4 sm:$0xff]  }
  0xc5   :  { %948 = vmatprep.mubr.bf16.mxu0 %v3431_v5 }
  0xc6   :  { %1624 = vmatpush2.bf16.msra.mxu1 %v2605_v22 }
  0xc7   :  { %1625 = vmatprep.subr.bf16.mxu1 %v2610_v25 }
  0xca   :  { %1626 = vmatpush2.bf16.msra.mxu1 %v2608_v24 }
  0xcb   :  { %1627 = vmatprep.subr.bf16.mxu1 %v2613_v27 }
  0xcc   :  { %949 = vmatmul.mubr.bf16.gmra.mxu0 %v2878_v35  ;;  %v2623_v35 = vld [vmem:[#allocation4 + $0x260] ss:$8 sps:$4 sm:$0xff]  }
  0xcd   :  { %958 = vmatprep.mubr.bf16.mxu0 %v3431_v5  ;;  %1756 = vmatpush1.bf16.msra.mxu0 %v2623_v35 }
  0xce   :  { %1628 = vmatpush2.bf16.msra.mxu1 %v2611_v26  ;;  %1757 = vmatprep.subr.bf16.mxu0 %v2634_v45 }
  0xcf   :  { %1629 = vmatprep.subr.bf16.mxu1 %v2619_v30 }
  0xd1   :  { %1758 = vmatpush1.bf16.msra.mxu0 %v2632_v44 }
  0xd2   :  { %1630 = vmatpush2.bf16.msra.mxu1 %v2617_v31 }
  0xd3   :  { %1631 = vmatprep.subr.bf16.mxu1 %v2622_v32 }
  0xd4   :  { %959 = vmatmul.mubr.bf16.gmra.mxu0 %v2888_v42  ;;  %v2637_v42 = vld [vmem:[#allocation4 + $0x84] ss:$8 sps:$4 sm:$0xff]  }
  0xd5   :  { %968 = vmatprep.mubr.bf16.mxu0 %v3431_v5 }
  0xd6   :  { %1632 = vmatpush2.bf16.msra.mxu1 %v2620_v33 }
  0xd7   :  { %1633 = vmatprep.subr.bf16.mxu1 %v2628_v39 }
  0xda   :  { %1634 = vmatpush2.bf16.msra.mxu1 %v2626_v38 }
  0xdb   :  { %1635 = vmatprep.subr.bf16.mxu1 %v2631_v40 }
  0xdc   :  { %969 = vmatmul.mubr.bf16.gmra.mxu0 %v2898_v46 }
  0xdd   :  { %978 = vmatprep.mubr.bf16.mxu0 %v3431_v5 }
  0xde   :  { %1636 = vmatpush2.bf16.msra.mxu1 %v2629_v41 }
  0xdf   :  { %1637 = vmatprep.subr.bf16.mxu1 %v2637_v42 }
  0xe2   :  { %1638 = vmatpush2.bf16.msra.mxu1 %v2635_v43 }
  0xe3   :  { %1680 = vmatprep.subr.bf16.mxu1 %v2640_v48 }
  0xe4   :  { %979 = vmatmul.mubr.bf16.gmra.mxu0 %v2908_v50 }
  0xe5   :  { %988 = vmatprep.mubr.bf16.mxu0 %v3431_v5 }
  0xec   :  { %989 = vmatmul.mubr.bf16.gmra.mxu0 %v2918_v54  ;;  %v2646_v54 = vld [vmem:[#allocation4 + $0x244] ss:$8 sps:$4 sm:$0xff]  }
  0xed   :  { %998 = vmatprep.mubr.bf16.mxu0 %v3431_v5  ;;  %1759 = vmatprep.subr.bf16.mxu0 %v2646_v54 }
  0xee   :  { %1760 = vmatpush1.bf16.msra.mxu0 %v2644_v55 }
  0xef   :  { %1761 = vmatprep.subr.bf16.mxu0 %v2652_v59 }
  0xf2   :  { %1762 = vmatpush1.bf16.msra.mxu0 %v2650_v60 }
  0xf3   :  { %1763 = vmatprep.subr.bf16.mxu0 %v2658_v0 }
  0xf4   :  { %999 = vmatmul.mubr.bf16.gmra.mxu0 %v2928_v58 }
  0xf5   :  { %1008 = vmatprep.mubr.bf16.mxu0 %v3431_v5 }
  0xf6   :  { %1764 = vmatpush1.bf16.msra.mxu0 %v2656_v1 }
  0xf7   :  { %1765 = vmatprep.subr.bf16.mxu0 %v2664_v6 }
  0xfa   :  { %1766 = vmatpush1.bf16.msra.mxu0 %v2662_v7 }
  0xfb   :  { %1767 = vmatprep.subr.bf16.mxu0 %v2670_v11 }
  0xfc   :  { %1009 = vmatmul.mubr.bf16.gmra.mxu0 %v2938_v62 }
  0xfd   :  { %1018 = vmatprep.mubr.bf16.mxu0 %v3431_v5 }
  0xfe   :  { %1768 = vmatpush1.bf16.msra.mxu0 %v2668_v12 }
 0x104   :  { %1019 = vmatmul.mubr.bf16.gmra.mxu0 %v2950_v2 }
 0x105   :  { %1028 = vmatprep.mubr.bf16.mxu0 %v3431_v5 }
 0x10c   :  { %1029 = vmatmul.mubr.bf16.gmra.mxu0 %v2955_v4 }
 0x10d   :  { %1038 = vmatprep.mubr.bf16.mxu0 %v3431_v5 }
 0x114   :  { %1039 = vmatmul.mubr.bf16.gmra.mxu0 %v109_v37 }
 0x115   :  { %1785 = vmatprep.mubr.bf16.mxu0 %v3431_v5 }
 0x11c   :  { %v2987_v46 = vpop.f32.mrf.mxu0 }
 0x11d   :  { %v2989_v47 = vpop.f32.mrf.mxu1 }
 0x11e   :  { %v2991_v49 = vpop.f32.mrf.mxu0 }
 0x11f   :  { %v2993_v50 = vpop.f32.mrf.mxu1 }
 0x120   :  { %v2995_v51 = vpop.f32.mrf.mxu0 }
 0x121   :  { %v2997_v52 = vpop.f32.mrf.mxu1 }
 0x122   :  { %v2999_v53 = vpop.f32.mrf.mxu0 }
 0x123   :  { %v3003_v57 = vpop.f32.mrf.mxu1 }
 0x124   :  { %v3001_v56 = vpop.f32.mrf.mxu0 }
 0x125   :  { %v3009_v62 = vpop.f32.mrf.mxu1 }
 0x126   :  { %v3005_v58 = vpop.f32.mrf.mxu0 }
 0x127   :  { %v3015_v3 = vpop.f32.mrf.mxu1 }
 0x128   :  { %v3007_v61 = vpop.f32.mrf.mxu0 }
 0x129   :  { %v3021_v9 = vpop.f32.mrf.mxu1 }
 0x12a   :  { %v3011_v63 = vpop.f32.mrf.mxu0 }
 0x12b   :  { %v3027_v14 = vpop.f32.mrf.mxu1 }
 0x12c   :  { %v3013_v2 = vpop.f32.mrf.mxu0 }
 0x12d   :  { %v3033_v17 = vpop.f32.mrf.mxu1 }
 0x12e   :  { %v3017_v4 = vpop.f32.mrf.mxu0 }
 0x12f   :  { %v3039_v20 = vpop.f32.mrf.mxu1 }
 0x130   :  { %v3019_v8 = vpop.f32.mrf.mxu0 }
 0x131   :  { %v3045_v23 = vpop.f32.mrf.mxu1 }
 0x132   :  { %v3023_v10 = vpop.f32.mrf.mxu0 }
 0x133   :  { %v3051_v26 = vpop.f32.mrf.mxu1 }
 0x134   :  { %v3025_v13 = vpop.f32.mrf.mxu0 }
 0x135   :  { %v3057_v29 = vpop.f32.mrf.mxu1 }
 0x136   :  { %v3029_v15 = vpop.f32.mrf.mxu0 }
 0x137   :  { %v3063_v32 = vpop.f32.mrf.mxu1 }
 0x138   :  { %v3031_v16 = vpop.f32.mrf.mxu0 }
 0x139   :  { %v3069_v35 = vpop.f32.mrf.mxu1 }
 0x13a   :  { %v3035_v18 = vpop.f32.mrf.mxu0 }
 0x13b   :  { %v3075_v38 = vpop.f32.mrf.mxu1 }
 0x13c   :  { %v3037_v19 = vpop.f32.mrf.mxu0 }
 0x13d   :  { %v3081_v41 = vpop.f32.mrf.mxu1 }
 0x13e   :  { %v3041_v21 = vpop.f32.mrf.mxu0 }
 0x13f   :  { %v3087_v44 = vpop.f32.mrf.mxu1 }
 0x140   :  { %v3043_v22 = vpop.f32.mrf.mxu0 }
 0x141   :  { %v3093_v54 = vpop.f32.mrf.mxu1 }
 0x142   :  { %v3047_v24 = vpop.f32.mrf.mxu0 }
 0x143   :  { %v3099_v60 = vpop.f32.mrf.mxu1 }
 0x144   :  { %v3049_v25 = vpop.f32.mrf.mxu0 }
 0x145   :  { %v3105_v6 = vpop.f32.mrf.mxu1 }
 0x146   :  { %v3053_v27 = vpop.f32.mrf.mxu0 }
 0x147   :  { %v3111_v12 = vpop.f32.mrf.mxu1 }
 0x148   :  { %v3055_v28 = vpop.f32.mrf.mxu0 }
 0x14a   :  { %v3059_v30 = vpop.f32.mrf.mxu0 }
 0x14c   :  { %v3061_v31 = vpop.f32.mrf.mxu0 }
 0x14e   :  { %v3065_v33 = vpop.f32.mrf.mxu0 }
 0x14f   :  { %3433 = vst [vmem:[#allocation8_spill] sm:$0xff] %v3065_v33 }
 0x150   :  { %v3067_v34 = vpop.f32.mrf.mxu0 }
 0x151   :  { %3434 = vst [vmem:[#allocation9_spill] sm:$0xff] %v3067_v34 }
 0x152   :  { %v3071_v36 = vpop.f32.mrf.mxu0 }
 0x153   :  { %3435 = vst [vmem:[#allocation10_spill] sm:$0xff] %v3071_v36 }
 0x154   :  { %v3073_v37 = vpop.f32.mrf.mxu0 }
 0x155   :  { %3436 = vst [vmem:[#allocation11_spill] sm:$0xff] %v3073_v37 }
 0x156   :  { %v3077_v39 = vpop.f32.mrf.mxu0 }
 0x157   :  { %3437 = vst [vmem:[#allocation12_spill] sm:$0xff] %v3077_v39  ;;  %v778_v39 = vadd.f32 %v2989_v47, %v2987_v46 }
 0x158   :  { %v3079_v40 = vpop.f32.mrf.mxu0 }
 0x159   :  { %3438 = vst [vmem:[#allocation13_spill] sm:$0xff] %v3079_v40 }
 0x15a   :  { %v3083_v42 = vpop.f32.mrf.mxu0 }
 0x15b   :  { %3439 = vst [vmem:[#allocation14_spill] sm:$0xff] %v3083_v42 }
 0x15c   :  { %v3085_v43 = vpop.f32.mrf.mxu0 }
 0x15d   :  { %3440 = vst [vmem:[#allocation15_spill] sm:$0xff] %v3085_v43 }
 0x15e   :  { %v3089_v45 = vpop.f32.mrf.mxu0 }
 0x15f   :  { %3441 = vst [vmem:[#allocation16_spill] sm:$0xff] %v3089_v45 }
 0x160   :  { %v3091_v48 = vpop.f32.mrf.mxu0 }
 0x161   :  { %3442 = vst [vmem:[#allocation17_spill] sm:$0xff] %v3091_v48 }
 0x162   :  { %v3095_v55 = vpop.f32.mrf.mxu0 }
 0x163   :  { %3443 = vst [vmem:[#allocation18_spill] sm:$0xff] %v3095_v55  ;;  %v3117_v55 = vpop.f32.mrf.mxu1 }
 0x164   :  { %v3097_v59 = vpop.f32.mrf.mxu0 }
 0x165   :  { %3444 = vst [vmem:[#allocation19_spill] sm:$0xff] %v3097_v59 }
 0x166   :  { %v3101_v0 = vpop.f32.mrf.mxu0 }
 0x167   :  { %3445 = vst [vmem:[#allocation20_spill] sm:$0xff] %v3101_v0  ;;  %v3123_v0 = vpop.f32.mrf.mxu1 }
 0x168   :  { %v3103_v1 = vpop.f32.mrf.mxu0 }
 0x169   :  { %3446 = vst [vmem:[#allocation21_spill] sm:$0xff] %v3103_v1 }
 0x16a   :  { %v3107_v7 = vpop.f32.mrf.mxu0 }
 0x16b   :  { %3447 = vst [vmem:[#allocation22_spill] sm:$0xff] %v3107_v7  ;;  %v3129_v7 = vpop.f32.mrf.mxu1 }
 0x16c   :  { %v3109_v11 = vpop.f32.mrf.mxu0  ;;  %3455 = vst [vmem:[#allocation30_spill] sm:$0xff] %v3129_v7 }
 0x16d   :  { %3448 = vst [vmem:[#allocation23_spill] sm:$0xff] %v3109_v11 }
 0x16e   :  { %v3113_v5 = vpop.f32.mrf.mxu0 }
 0x16f   :  { %3449 = vst [vmem:[#allocation24_spill] sm:$0xff] %v3113_v5  ;;  %v3133_v5 = vpop.f32.mrf.mxu1 }
 0x170   :  { %v3115_v45 = vpop.f32.mrf.mxu0  ;;  %3457 = vst [vmem:[#allocation32_spill] sm:$0xff] %v3133_v5 }
 0x171   :  { %3450 = vst [vmem:[#allocation25_spill] sm:$0xff] %v3115_v45 }
 0x172   :  { %v3119_v59 = vpop.f32.mrf.mxu0 }
 0x173   :  { %3451 = vst [vmem:[#allocation26_spill] sm:$0xff] %v3119_v59 }
 0x174   :  { %v3121_v48 = vpop.f32.mrf.mxu0 }
 0x175   :  { %3452 = vst [vmem:[#allocation27_spill] sm:$0xff] %v3121_v48  ;;  %v782_v48 = vadd.f32 %v2997_v52, %v2995_v51  ;;  %v788_v52 = vadd.f32 %v3009_v62, %v3001_v56  ;;  %v3160_v56 = vld [vmem:[%s3425_s2] ss:$0 sm:$0xff] }
 0x176   :  { %v3125_v1 = vpop.f32.mrf.mxu0 }
 0x177   :  { %3453 = vst [vmem:[#allocation28_spill] sm:$0xff] %v3125_v1  ;;  %v780_v1 = vadd.f32 %v2993_v50, %v2991_v49  ;;  %v792_v49 = vadd.f32 %v3021_v9, %v3007_v61 }
 0x178   :  { %v3127_v43 = vpop.f32.mrf.mxu0 }
 0x179   :  { %3454 = vst [vmem:[#allocation29_spill] sm:$0xff] %v3127_v43  ;;  %v784_v43 = vadd.f32 %v3003_v57, %v2999_v53  ;;  %v790_v57 = vadd.f32 %v3015_v3, %v3005_v58  ;;  %v798_v3 = vadd.f32 %v3033_v17, %v3013_v2 }
 0x17a   :  { %v3131_v11 = vpop.f32.mrf.mxu0 }
 0x17b   :  { %3456 = vst [vmem:[#allocation31_spill] sm:$0xff] %v3131_v11  ;;  %v3143_v11 = vpop.f32.mrf.mxu1 }
 0x17c   :  { %v930_v42 = vpop.f32.mrf.mxu0 }
 0x17d   :  { %v931_v40 = vadd.f32 %v930_v42, %v778_v39  ;;  %v3145_v47 = vpop.f32.mrf.mxu1 }
 0x17e   :  { %v932_v45 = vpop.f32.mrf.mxu0 }
 0x17f   :  { %v933_v5 = vadd.f32 %v932_v45, %v780_v1  ;;  %v800_v45 = vadd.f32 %v3039_v20, %v3017_v4 }
 0x180   :  { %v934_v59 = vpop.f32.mrf.mxu0 }
 0x181   :  { %v935_v37 = vadd.f32 %v934_v59, %v782_v48  ;;  %v804_v59 = vadd.f32 %v3051_v26, %v3023_v10  ;;  %v808_v10 = vadd.f32 %v3057_v29, %v3025_v13  ;;  %v812_v26 = vadd.f32 %v3069_v35, %v3031_v16 }
 0x182   :  { %v936_v36 = vpop.f32.mrf.mxu0 }
 0x183   :  { %v1049_v33 = vmax.f32 %v931_v40, %v935_v37  ;;  %v937_v34 = vadd.f32 %v936_v36, %v784_v43  ;;  %v794_v37 = vadd.f32 %v3027_v14, %v3011_v63  ;;  %v802_v14 = vadd.f32 %v3045_v23, %v3019_v8 }
 0x184   :  { %v940_v7 = vpop.f32.mrf.mxu0 }
 0x185   :  { %v1050_v46 = vmax.f32 %v933_v5, %v937_v34  ;;  %v941_v36 = vadd.f32 %v940_v7, %v788_v52  ;;  %v3155_v5 = vpop.f32.mrf.mxu1 }
 0x186   :  { %v942_v51 = vpop.f32.mrf.mxu0 }
 0x187   :  { %v1073_v50 = vmax.f32 %v1049_v33, %v1050_v46  ;;  %v943_v62 = vadd.f32 %v942_v51, %v790_v57  ;;  %v3162_v42 = vpop.f32.mrf.mxu1 }
 0x188   :  { %v944_v53 = vpop.f32.mrf.mxu0 }
 0x189   :  { %v945_v39 = vadd.f32 %v944_v53, %v792_v49  ;;  %v1092_v58 = vadd.f32 %v3160_v56, %v1073_v50  ;;  %v3174_v51 = vpop.f32.mrf.mxu1 }
 0x18a   :  { %v946_v34 = vpop.f32.mrf.mxu0 }
 0x18b   :  { %v1051_v61 = vmax.f32 %v941_v36, %v945_v39  ;;  %v947_v9 = vadd.f32 %v946_v34, %v794_v37  ;;  %v1104_v52 = vmax.f32 %v1092_v58, 0.0  ;;  %v3176_v4 = vpop.f32.mrf.mxu1  ;;  %v810_v36 = vadd.f32 %v3063_v32, %v3029_v15 }
 0x18c   :  { %v950_v33 = vpop.f32.mrf.mxu0  ;;  %v814_v34 = vadd.f32 %v3075_v38, %v3035_v18  ;;  %v818_v18 = vadd.f32 %v3081_v41, %v3037_v19  ;;  %v822_v38 = vadd.f32 %v3093_v54, %v3043_v22  ;;  %v2649_v22 = vld [vmem:[#allocation4 + $0x154] ss:$8 sps:$4 sm:$0xff]  }
 0x18d   :  { %v1052_v40 = vmax.f32 %v943_v62, %v947_v9  ;;  %v951_v1 = vadd.f32 %v950_v33, %v798_v3  ;;  %v3187_v33 = vpop.f32.mrf.mxu1 }
 0x18e   :  { %v952_v63 = vpop.f32.mrf.mxu0 }
 0x18f   :  { %v1074_v43 = vmax.f32 %v1051_v61, %v1052_v40  ;;  %v953_v2 = vadd.f32 %v952_v63, %v800_v45  ;;  %v3189_v15 = vpop.f32.mrf.mxu1 }
 0x190   :  { %v954_v48 = vpop.f32.mrf.mxu0 }
 0x191   :  { %v955_v7 = vadd.f32 %v954_v48, %v802_v14  ;;  %v1093_v46 = vadd.f32 %v3160_v56, %v1074_v43  ;;  %v2638_v14 = vld [vmem:[#allocation4 + $0x170] ss:$8 sps:$4 sm:$0xff]   ;;  %v2643_v43 = vld [vmem:[#allocation4 + $0x164] ss:$8 sps:$4 sm:$0xff]   ;;  %v820_v48 = vadd.f32 %v3087_v44, %v3041_v21  ;;  %v3200_v19 = vpop.f32.mrf.mxu1 }
 0x192   :  { %v956_v49 = vpop.f32.mrf.mxu0 }
 0x193   :  { %v1053_v17 = vmax.f32 %v951_v1, %v955_v7  ;;  %v957_v50 = vadd.f32 %v956_v49, %v804_v59  ;;  %v1105_v8 = vmax.f32 %v1093_v46, 0.0  ;;  %v824_v1 = vadd.f32 %v3099_v60, %v3047_v24  ;;  %v3204_v60 = vpop.f32.mrf.mxu1 }
 0x194   :  { %v960_v23 = vpop.f32.mrf.mxu0 }
 0x195   :  { %v1054_v53 = vmax.f32 %v953_v2, %v957_v50  ;;  %v1116_v57 = vpack.c.bf16 %v1105_v8, %v1104_v52  ;;  %v961_v62 = vadd.f32 %v960_v23, %v808_v10  ;;  %v2641_v52 = vld [vmem:[#allocation4 + $0x160] ss:$8 sps:$4 sm:$0xff]  }
 0x196   :  { %v962_v20 = vpop.f32.mrf.mxu0 }
 0x197   :  { %v1075_v37 = vmax.f32 %v1053_v17, %v1054_v53  ;;  %v963_v58 = vadd.f32 %v962_v20, %v810_v36  ;;  %v2655_v53 = vld [vmem:[#allocation4 + $0x144] ss:$8 sps:$4 sm:$0xff]   ;;  %v832_v20 = vadd.f32 %v3117_v55, %v3055_v28  ;;  %v834_v36 = vadd.f32 %v3123_v0, %v3059_v30  ;;  %v2659_v30 = vld [vmem:[#allocation4 + $0x130] ss:$8 sps:$4 sm:$0xff]  }
 0x198   :  { %v964_v39 = vpop.f32.mrf.mxu0 }
 0x199   :  { %v965_v61 = vadd.f32 %v964_v39, %v812_v26  ;;  %v1094_v9 = vadd.f32 %v3160_v56, %v1075_v37  ;;  %v830_v26 = vadd.f32 %v3111_v12, %v3053_v27 }
 0x19a   :  { %v966_v40 = vpop.f32.mrf.mxu0 }
 0x19b   :  { %v1055_v13 = vmax.f32 %v961_v62, %v965_v61  ;;  %v967_v29 = vadd.f32 %v966_v40, %v814_v34  ;;  %v1106_v63 = vmax.f32 %v1094_v9, 0.0  ;;  %v2653_v62 = vld [vmem:[#allocation4 + $0x140] ss:$8 sps:$4 sm:$0xff]   ;;  %v3215_v9 = vpop.f32.mrf.mxu1 }
 0x19c   :  { %v970_v16 = vpop.f32.mrf.mxu0 }
 0x19d   :  { %v1056_v35 = vmax.f32 %v963_v58, %v967_v29  ;;  %v1120_v3 = vpack.c.bf16 %v1106_v63, %v1105_v8  ;;  %v971_v7 = vadd.f32 %v970_v16, %v818_v18  ;;  %v2647_v8 = vld [vmem:[#allocation4 + $0x150] ss:$8 sps:$4 sm:$0xff]   ;;  %v3219_v0 = vpop.f32.mrf.mxu1  ;;  %v3461_v18 = vld [vmem:[#allocation32_spill] sm:$0xff] }
 0x19e   :  { %v972_v32 = vpop.f32.mrf.mxu0  ;;  %v3458_v16 = vld [vmem:[#allocation30_spill] sm:$0xff] }
 0x19f   :  { %v1076_v45 = vmax.f32 %v1055_v13, %v1056_v35  ;;  %1639 = vmatprep.mubr.bf16.mxu1 %v1120_v3  ;;  %v973_v54 = vadd.f32 %v972_v32, %v820_v48  ;;  %v838_v35 = vadd.f32 %v3458_v16, %v3061_v31  ;;  %v3459_v3 = vld [vmem:[#allocation9_spill] sm:$0xff]  ;;  %v3462_v48 = vld [vmem:[#allocation10_spill] sm:$0xff] }
 0x1a0   :  { %v974_v59 = vpop.f32.mrf.mxu0  ;;  %1640 = vmatmul.mubr.bf16.vlgmr.msra.gmra.mxu1 %v1116_v57  ;;  %v828_v57 = vadd.f32 %v3105_v6, %v3049_v25  ;;  %v2661_v6 = vld [vmem:[#allocation4 + $0x134] ss:$8 sps:$4 sm:$0xff]   ;;  %v2665_v31 = vld [vmem:[#allocation4 + $0x120] ss:$8 sps:$4 sm:$0xff]  }
 0x1a1   :  { %v975_v46 = vadd.f32 %v974_v59, %v822_v38  ;;  %1681 = vmatpush1.bf16.msra.mxu1 %v2638_v14  ;;  %v1095_v49 = vadd.f32 %v3160_v56, %v1076_v45  ;;  %v842_v14 = vadd.f32 %v3143_v11, %v3459_v3  ;;  %v844_v59 = vadd.f32 %v3145_v47, %v3462_v48  ;;  %v2671_v47 = vld [vmem:[#allocation4 + $0x110] ss:$8 sps:$4 sm:$0xff]   ;;  %v2682_v3 = vld [vmem:[#allocation4 + $0x1e4] ss:$8 sps:$4 sm:$0xff]  }
 0x1a2   :  { %v976_v41 = vpop.f32.mrf.mxu0  ;;  %1682 = vmatprep.subr.bf16.mxu1 %v2643_v43  ;;  %v3460_v43 = vld [vmem:[#allocation8_spill] sm:$0xff] }
 0x1a3   :  { %v1057_v2 = vmax.f32 %v971_v7, %v975_v46  ;;  %v977_v17 = vadd.f32 %v976_v41, %v824_v1  ;;  %v1107_v21 = vmax.f32 %v1095_v49, 0.0  ;;  %v840_v38 = vadd.f32 %v3461_v18, %v3460_v43  ;;  %v2673_v49 = vld [vmem:[#allocation4 + $0x114] ss:$8 sps:$4 sm:$0xff]   ;;  %v3469_v43 = vld [vmem:[#allocation17_spill] sm:$0xff] }
 0x1a4   :  { %v980_v44 = vpop.f32.mrf.mxu0  ;;  %v862_v18 = vadd.f32 %v3200_v19, %v3469_v43  ;;  %v3477_v43 = vld [vmem:[#allocation25_spill] sm:$0xff] }
 0x1a5   :  { %v1058_v50 = vmax.f32 %v973_v54, %v977_v17  ;;  %1683 = vmatpush1.bf16.msra.mxu1 %v2641_v52  ;;  %v3202_v24 = vpack.c.bf16 %v1107_v21, %v1106_v63  ;;  %v981_v39 = vadd.f32 %v980_v44, %v828_v57  ;;  %v2667_v63 = vld [vmem:[#allocation4 + $0x124] ss:$8 sps:$4 sm:$0xff]   ;;  %v3232_v52 = vpop.f32.mrf.mxu1 }
 0x1a6   :  { %v982_v23 = vpop.f32.mrf.mxu0  ;;  %1684 = vmatprep.subr.bf16.mxu1 %v2649_v22 }
 0x1a7   :  { %v1077_v10 = vmax.f32 %v1057_v2, %v1058_v50  ;;  %v983_v28 = vadd.f32 %v982_v23, %v830_v26  ;;  %v3236_v50 = vpop.f32.mrf.mxu1  ;;  %v2676_v23 = vld [vmem:[#allocation4 + $0x104] ss:$8 sps:$4 sm:$0xff]  }
 0x1a8   :  { %v984_v37 = vpop.f32.mrf.mxu0 }
 0x1a9   :  { %v985_v34 = vadd.f32 %v984_v37, %v832_v20  ;;  %1685 = vmatpush1.bf16.msra.mxu1 %v2647_v8  ;;  %v1096_v61 = vadd.f32 %v3160_v56, %v1077_v10  ;;  %v3464_v20 = vld [vmem:[#allocation13_spill] sm:$0xff]  ;;  %v3465_v37 = vld [vmem:[#allocation12_spill] sm:$0xff] }
 0x1aa   :  { %v986_v25 = vpop.f32.mrf.mxu0  ;;  %1686 = vmatprep.subr.bf16.mxu1 %v2655_v53  ;;  %v3463_v53 = vld [vmem:[#allocation11_spill] sm:$0xff]  ;;  %v852_v10 = vadd.f32 %v3174_v51, %v3464_v20 }
 0x1ab   :  { %v1059_v55 = vmax.f32 %v981_v39, %v985_v34  ;;  %v987_v40 = vadd.f32 %v986_v25, %v834_v36  ;;  %v1108_v58 = vmax.f32 %v1096_v61, 0.0  ;;  %v848_v57 = vadd.f32 %v3155_v5, %v3463_v53  ;;  %v2688_v53 = vld [vmem:[#allocation4 + $0x1c4] ss:$8 sps:$4 sm:$0xff]  }
 0x1ac   :  { %v990_v27 = vpop.f32.mrf.mxu0  ;;  %v850_v36 = vadd.f32 %v3162_v42, %v3465_v37  ;;  %v3466_v34 = vmov 0  }
 0x1ad   :  { %v1060_v12 = vmax.f32 %v983_v28, %v987_v40  ;;  %1687 = vmatpush1.bf16.msra.mxu1 %v2653_v62  ;;  %v3217_v13 = vpack.c.bf16 %v1108_v58, %v1107_v21  ;;  %v991_v7 = vadd.f32 %v990_v27, %v838_v35  ;;  %v3467_v62 = vld [vmem:[#allocation14_spill] sm:$0xff]  ;;  %v2674_v28 = vld [vmem:[#allocation4 + $0x100] ss:$8 sps:$4 sm:$0xff]  }
 0x1ae   :  { %v992_v29 = vpop.f32.mrf.mxu0  ;;  %1688 = vmatprep.subr.bf16.mxu1 %v2661_v6  ;;  %v854_v61 = vadd.f32 %v3176_v4, %v3467_v62  ;;  %v2679_v40 = vld [vmem:[#allocation4 + $0x1f4] ss:$8 sps:$4 sm:$0xff]   ;;  %v2677_v4 = vld [vmem:[#allocation4 + $0x1f0] ss:$8 sps:$4 sm:$0xff]  }
 0x1af   :  { %v1078_v32 = vmax.f32 %v1059_v55, %v1060_v12  ;;  %1649 = vmatprep.mubr.bf16.mxu1 %v3217_v13  ;;  %v993_v22 = vadd.f32 %v992_v29, %v840_v38  ;;  %v3249_v55 = vpop.f32.mrf.mxu1 }
 0x1b0   :  { %v994_v45 = vpop.f32.mrf.mxu0  ;;  %1650 = vmatmul.mubr.bf16.gmra.mxu1 %v3202_v24 }
 0x1b1   :  { %v1097_v1 = vadd.f32 %v3160_v56, %v1078_v32  ;;  %v995_v46 = vadd.f32 %v994_v45, %v842_v14  ;;  %1689 = vmatpush1.bf16.msra.mxu1 %v2659_v30  ;;  %v3253_v16 = vpop.f32.mrf.mxu1  ;;  %v3468_v14 = vld [vmem:[#allocation15_spill] sm:$0xff]  ;;  %v3470_v45 = vld [vmem:[#allocation16_spill] sm:$0xff] }
 0x1b2   :  { %v996_v11 = vpop.f32.mrf.mxu0  ;;  %1690 = vmatprep.subr.bf16.mxu1 %v2667_v63  ;;  %v858_v32 = vadd.f32 %v3187_v33, %v3468_v14  ;;  %v860_v48 = vadd.f32 %v3189_v15, %v3470_v45  ;;  %v3476_v14 = vld [vmem:[#allocation23_spill] sm:$0xff]  ;;  %v3478_v45 = vld [vmem:[#allocation24_spill] sm:$0xff] }
 0x1b3   :  { %v1109_v41 = vmax.f32 %v1097_v1, 0.0  ;;  %v1061_v54 = vmax.f32 %v991_v7, %v995_v46  ;;  %v997_v2 = vadd.f32 %v996_v11, %v844_v59  ;;  %v3471_v1 = vld [vmem:[#allocation18_spill] sm:$0xff]  ;;  %v2680_v11 = vld [vmem:[#allocation4 + $0x1e0] ss:$8 sps:$4 sm:$0xff]  }
 0x1b4   :  { %v1000_v17 = vpop.f32.mrf.mxu0  ;;  %v864_v7 = vadd.f32 %v3204_v60, %v3471_v1 }
 0x1b5   :  { %v3234_v21 = vpack.c.bf16 %v1109_v41, %v1108_v58  ;;  %v1062_v44 = vmax.f32 %v993_v22, %v997_v2  ;;  %1691 = vmatpush1.bf16.msra.mxu1 %v2665_v31  ;;  %v1001_v25 = vadd.f32 %v1000_v17, %v848_v57  ;;  %v3472_v57 = vld [vmem:[#allocation19_spill] sm:$0xff] }
 0x1b6   :  { %v1002_v8 = vpop.f32.mrf.mxu0  ;;  %1692 = vmatprep.subr.bf16.mxu1 %v2673_v49  ;;  %v881_v49 = vpop.f32.mrf.mxu1  ;;  %v868_v20 = vadd.f32 %v3215_v9, %v3472_v57  ;;  %v3481_v57 = vld [vmem:[#allocation29_spill] sm:$0xff] }
 0x1b7   :  { %v1079_v26 = vmax.f32 %v1061_v54, %v1062_v44  ;;  %1786 = vmatmul.mubr.bf16.vlgmr.msra.gmra.mxu0 %v3234_v21  ;;  %v1003_v58 = vadd.f32 %v1002_v8, %v850_v36  ;;  %v3474_v36 = vld [vmem:[#allocation20_spill] sm:$0xff] }
 0x1b8   :  { %v1004_v39 = vpop.f32.mrf.mxu0  ;;  %1795 = vmatprep.mubr.bf16.mxu0 %v3466_v34  ;;  %v883_v60 = vpop.f32.mrf.mxu1 }
 0x1b9   :  { %v1005_v6 = vadd.f32 %v1004_v39, %v852_v10  ;;  %1693 = vmatpush1.bf16.msra.mxu1 %v2671_v47  ;;  %v1098_v5 = vadd.f32 %v3160_v56, %v1079_v26  ;;  %v2683_v47 = vld [vmem:[#allocation4 + $0x1d0] ss:$8 sps:$4 sm:$0xff]   ;;  %v3473_v10 = vld [vmem:[#allocation21_spill] sm:$0xff]  ;;  %v870_v39 = vadd.f32 %v3219_v0, %v3474_v36 }
 0x1ba   :  { %v1006_v51 = vpop.f32.mrf.mxu0  ;;  %1694 = vmatprep.subr.bf16.mxu1 %v2676_v23  ;;  %v872_v26 = vadd.f32 %v3232_v52, %v3473_v10 }
 0x1bb   :  { %v1063_v27 = vmax.f32 %v1001_v25, %v1005_v6  ;;  %v1007_v42 = vadd.f32 %v1006_v51, %v854_v61  ;;  %v1110_v12 = vmax.f32 %v1098_v5, 0.0  ;;  %v3475_v61 = vld [vmem:[#allocation22_spill] sm:$0xff]  ;;  %v2686_v5 = vld [vmem:[#allocation4 + $0x1c0] ss:$8 sps:$4 sm:$0xff]   ;;  %v887_v51 = vpop.f32.mrf.mxu1 }
 0x1bc   :  { %v1010_v30 = vpop.f32.mrf.mxu0  ;;  %v874_v25 = vadd.f32 %v3236_v50, %v3475_v61  ;;  %v2689_v50 = vld [vmem:[#allocation4 + $0x1b0] ss:$8 sps:$4 sm:$0xff]  }
 0x1bd   :  { %v1064_v29 = vmax.f32 %v1003_v58, %v1007_v42  ;;  %1695 = vmatpush1.bf16.msra.mxu1 %v2674_v28  ;;  %v3251_v63 = vpack.c.bf16 %v1110_v12, %v1109_v41  ;;  %v1011_v46 = vadd.f32 %v1010_v30, %v858_v32  ;;  %v2685_v41 = vld [vmem:[#allocation4 + $0x1d4] ss:$8 sps:$4 sm:$0xff]   ;;  %v878_v32 = vadd.f32 %v3249_v55, %v3476_v14 }
 0x1be   :  { %v1012_v35 = vpop.f32.mrf.mxu0  ;;  %1696 = vmatprep.subr.bf16.mxu1 %v2679_v40  ;;  %v2691_v40 = vld [vmem:[#allocation4 + $0x1b4] ss:$8 sps:$4 sm:$0xff]  }
 0x1bf   :  { %v1080_v38 = vmax.f32 %v1063_v27, %v1064_v29  ;;  %1659 = vmatprep.mubr.bf16.mxu1 %v3251_v63  ;;  %v1013_v22 = vadd.f32 %v1012_v35, %v860_v48  ;;  %v880_v48 = vadd.f32 %v3253_v16, %v3478_v45  ;;  %v2712_v14 = vld [vmem:[%s3428_s5 + $0xb8] sm:$0xff]   ;;  %v2717_v45 = vld [vmem:[%s3428_s5 + $0x48] sm:$0xff]  }
 0x1c0   :  { %v1014_v59 = vpop.f32.mrf.mxu0  ;;  %1660 = vmatmul.mubr.bf16.gmra.mxu1 %v3234_v21 }
 0x1c1   :  { %v1015_v31 = vadd.f32 %v1014_v59, %v862_v18  ;;  %1697 = vmatpush2.bf16.msra.mxu1 %v2677_v4  ;;  %v1099_v33 = vadd.f32 %v3160_v56, %v1080_v38  ;;  %v889_v4 = vpop.f32.mrf.mxu1  ;;  %v882_v18 = vadd.f32 %v881_v49, %v3477_v43  ;;  %v3479_v59 = vld [vmem:[#allocation26_spill] sm:$0xff] }
 0x1c2   :  { %v1016_v19 = vpop.f32.mrf.mxu0  ;;  %1698 = vmatprep.subr.bf16.mxu1 %v2682_v3  ;;  %v2694_v3 = vld [vmem:[#allocation4 + $0x1a4] ss:$8 sps:$4 sm:$0xff]   ;;  %v884_v1 = vadd.f32 %v883_v60, %v3479_v59  ;;  %v2714_v43 = vld [vmem:[%s3428_s5 + $0xf0] sm:$0xff]  }
 0x1c3   :  { %v1065_v54 = vmax.f32 %v1011_v46, %v1015_v31  ;;  %v1017_v2 = vadd.f32 %v1016_v19, %v864_v7  ;;  %v1111_v15 = vmax.f32 %v1099_v33, 0.0  ;;  %v891_v33 = vpop.f32.mrf.mxu1  ;;  %v2697_v19 = vld [vmem:[#allocation4 + $0x194] ss:$8 sps:$4 sm:$0xff]   ;;  %v2719_v59 = vld [vmem:[%s3428_s5 + $0x8] sm:$0xff]  }
 0x1c4   :  { %v1020_v17 = vpop.f32.mrf.mxu0 }
 0x1c5   :  { %v1066_v44 = vmax.f32 %v1013_v22, %v1017_v2  ;;  %1699 = vmatpush2.bf16.msra.mxu1 %v2680_v11  ;;  %v3266_v8 = vpack.c.bf16 %v1111_v15, %v1110_v12  ;;  %v1021_v6 = vadd.f32 %v1020_v17, %v868_v20  ;;  %v2692_v11 = vld [vmem:[#allocation4 + $0x1a0] ss:$8 sps:$4 sm:$0xff]   ;;  %v2695_v17 = vld [vmem:[#allocation4 + $0x190] ss:$8 sps:$4 sm:$0xff]   ;;  %v892_v20 = vadd.f32 %v891_v33, %v3481_v57 }
 0x1c6   :  { %v1022_v23 = vpop.f32.mrf.mxu0  ;;  %1700 = vmatprep.subr.bf16.mxu1 %v2685_v41  ;;  %v2726_v33 = vld [vmem:[%s3428_s5 + $0x98] sm:$0xff]  }
 0x1c7   :  { %v1081_v37 = vmax.f32 %v1065_v54, %v1066_v44  ;;  %1796 = vmatmul.mubr.bf16.gmra.mxu0 %v3266_v8  ;;  %v1023_v58 = vadd.f32 %v1022_v23, %v870_v39  ;;  %v3480_v23 = vld [vmem:[#allocation27_spill] sm:$0xff] }
 0x1c8   :  { %v1024_v62 = vpop.f32.mrf.mxu0  ;;  %1805 = vmatprep.mubr.bf16.mxu0 %v3466_v34  ;;  %v3483_v39 = vld [vmem:[#allocation31_spill] sm:$0xff] }
 0x1c9   :  { %v1025_v28 = vadd.f32 %v1024_v62, %v872_v26  ;;  %1701 = vmatpush2.bf16.msra.mxu1 %v2683_v47  ;;  %v1100_v9 = vadd.f32 %v3160_v56, %v1081_v37  ;;  %v893_v47 = vpop.f32.mrf.mxu1  ;;  %v3482_v26 = vld [vmem:[#allocation28_spill] sm:$0xff] }
 0x1ca   :  { %v1026_v52 = vpop.f32.mrf.mxu0  ;;  %1702 = vmatprep.subr.bf16.mxu1 %v2688_v53  ;;  %v888_v53 = vadd.f32 %v887_v51, %v3480_v23  ;;  %v890_v37 = vadd.f32 %v889_v4, %v3482_v26  ;;  %v894_v62 = vadd.f32 %v893_v47, %v3483_v39  ;;  %v2709_v4 = vld [vmem:[%s3428_s5 + $0x58] sm:$0xff]  }
 0x1cb   :  { %v1067_v27 = vmax.f32 %v1021_v6, %v1025_v28  ;;  %v1027_v42 = vadd.f32 %v1026_v52, %v874_v25  ;;  %v1112_v0 = vmax.f32 %v1100_v9, 0.0  ;;  %v2698_v6 = vld [vmem:[#allocation4 + $0x180] ss:$8 sps:$4 sm:$0xff]  }
 0x1cc   :  { %v1030_v12 = vpop.f32.mrf.mxu0 }
 0x1cd   :  { %v1068_v30 = vmax.f32 %v1023_v58, %v1027_v42  ;;  %1703 = vmatpush2.bf16.msra.mxu1 %v2686_v5  ;;  %v3279_v29 = vpack.c.bf16 %v1112_v0, %v1111_v15  ;;  %v1031_v46 = vadd.f32 %v1030_v12, %v878_v32  ;;  %v2713_v32 = vld [vmem:[%s3428_s5 + $0x50] sm:$0xff]  }
 0x1ce   :  { %v1032_v35 = vpop.f32.mrf.mxu0  ;;  %1704 = vmatprep.subr.bf16.mxu1 %v2691_v40 }
 0x1cf   :  { %v1082_v38 = vmax.f32 %v1067_v27, %v1068_v30  ;;  %1669 = vmatprep.mubr.bf16.mxu1 %v3279_v29  ;;  %v1033_v41 = vadd.f32 %v1032_v35, %v880_v48  ;;  %v2701_v30 = vld [vmem:[%s3428_s5 + $0x78] sm:$0xff]   ;;  %v2718_v48 = vld [vmem:[%s3428_s5 + $0xe8] sm:$0xff]  }
 0x1d0   :  { %v1034_v7 = vpop.f32.mrf.mxu0  ;;  %1670 = vmatmul.mubr.bf16.gmra.mxu1 %v3266_v8  ;;  %v2710_v35 = vld [vmem:[%s3428_s5 + $0xf8] sm:$0xff]  }
 0x1d1   :  { %v1035_v31 = vadd.f32 %v1034_v7, %v882_v18  ;;  %1705 = vmatpush2.bf16.msra.mxu1 %v2689_v50  ;;  %1712 = vmatprep.mubr.bf16.mxu1 %v3217_v13  ;;  %v1101_v55 = vadd.f32 %v3160_v56, %v1082_v38  ;;  %v2700_v13 = vld [vmem:[#allocation4 + $0x184] ss:$8 sps:$4 sm:$0xff]   ;;  %v2715_v18 = vld [vmem:[%s3428_s5 + $0x10] sm:$0xff]  }
 0x1d2   :  { %v1036_v49 = vpop.f32.mrf.mxu0  ;;  %1706 = vmatprep.subr.bf16.mxu1 %v2694_v3  ;;  %v2708_v50 = vld [vmem:[%s3428_s5 + $0x20] sm:$0xff]   ;;  %v2711_v3 = vld [vmem:[%s3428_s5 + $0x18] sm:$0xff]   ;;  %2434 = vmatprep.subr.bf16.mxu0 %v2710_v35  ;;  %v2716_v38 = vld [vmem:[%s3428_s5 + $0xb0] sm:$0xff]  }
 0x1d3   :  { %v1069_v22 = vmax.f32 %v1031_v46, %v1035_v31  ;;  %v1037_v16 = vadd.f32 %v1036_v49, %v884_v1  ;;  %v1113_v54 = vmax.f32 %v1101_v55, 0.0  ;;  %2435 = vmatpush3.bf16.msra.mxu0 %v2712_v14  ;;  %v2720_v1 = vld [vmem:[%s3428_s5 + $0xa8] sm:$0xff]   ;;  %v2721_v7 = vld [vmem:[%s3428_s5 + $0x40] sm:$0xff]   ;;  %v2725_v55 = vld [vmem:[%s3428_s5 + $0xd8] sm:$0xff]  }
 0x1d4   :  { %v1040_v2 = vpop.f32.mrf.mxu0  ;;  %2436 = vmatprep.subr.bf16.mxu0 %v2714_v43  ;;  %v2722_v46 = vld [vmem:[%s3428_s5 + $0xe0] sm:$0xff]   ;;  %v2727_v49 = vld [vmem:[%s3428_s5 + $0xd0] sm:$0xff]  }
 0x1d5   :  { %v1070_v15 = vmax.f32 %v1033_v41, %v1037_v16  ;;  %1707 = vmatpush2.bf16.msra.mxu1 %v2692_v11  ;;  %v1124_v44 = vpack.c.bf16 %v1113_v54, %v1112_v0  ;;  %v1041_v61 = vadd.f32 %v1040_v2, %v888_v53  ;;  %v2723_v31 = vld [vmem:[%s3428_s5] sm:$0xff]   ;;  %v2729_v41 = vld [vmem:[%s3428_s5 + $0xc8] sm:$0xff]  }
 0x1d6   :  { %v1042_v60 = vpop.f32.mrf.mxu0  ;;  %1708 = vmatprep.subr.bf16.mxu1 %v2697_v19  ;;  %v2724_v11 = vld [vmem:[%s3428_s5 + $0xa0] sm:$0xff]   ;;  %v2728_v19 = vld [vmem:[%s3428_s5 + $0x90] sm:$0xff]  }
 0x1d7   :  { %v1083_v10 = vmax.f32 %v1069_v22, %v1070_v15  ;;  %1806 = vmatmul.mubr.bf16.gmra.mxu0 %v1124_v44  ;;  %v1043_v9 = vadd.f32 %v1042_v60, %v890_v37  ;;  %v2730_v22 = vld [vmem:[%s3428_s5 + $0x88] sm:$0xff]   ;;  %v2731_v16 = vld [vmem:[%s3428_s5 + $0xc0] sm:$0xff]  }
 0x1d8   :  { %v1044_v36 = vpop.f32.mrf.mxu0  ;;  %1815 = vmatprep.mubr.bf16.mxu0 %v3466_v34  ;;  %2437 = vmatpush3.bf16.msra.mxu0 %v2716_v38 }
 0x1d9   :  { %v1045_v25 = vadd.f32 %v1044_v36, %v892_v20  ;;  %1709 = vmatpush2.bf16.msra.mxu1 %v2695_v17  ;;  %v1102_v28 = vadd.f32 %v3160_v56, %v1083_v10  ;;  %2438 = vmatprep.subr.bf16.mxu0 %v2718_v48 }
 0x1da   :  { %v1046_v5 = vpop.f32.mrf.mxu0  ;;  %1710 = vmatprep.subr.bf16.mxu1 %v2700_v13 }
 0x1db   :  { %v1071_v51 = vmax.f32 %v1041_v61, %v1045_v25  ;;  %v1047_v52 = vadd.f32 %v1046_v5, %v894_v62  ;;  %v1114_v40 = vmax.f32 %v1102_v28, 0.0 }
 0x1dc   :  { %2439 = vmatpush3.bf16.msra.mxu0 %v2720_v1 }
 0x1dd   :  { %v1072_v58 = vmax.f32 %v1043_v9, %v1047_v52  ;;  %1711 = vmatpush2.bf16.msra.mxu1 %v2698_v6  ;;  %v1125_v27 = vpack.c.bf16 %v1114_v40, %v1113_v54  ;;  %2440 = vmatprep.subr.bf16.mxu0 %v2722_v46  ;;  %v2732_v54 = vld [vmem:[%s3428_s5 + $0x80] sm:$0xff]  }
 0x1de   :  { %2412 = vmatprep.subr.bf16.mxu1 %v2701_v30 }
 0x1df   :  { %v1084_v42 = vmax.f32 %v1071_v51, %v1072_v58 }
 0x1e0   :  { %1713 = vmatmul.mubr.bf16.vlgmr.msra.gmra.mxu1 %v3202_v24  ;;  %v2702_v24 = vld [vmem:[%s3428_s5 + $0x38] sm:$0xff]   ;;  %2441 = vmatpush3.bf16.msra.mxu0 %v2724_v11 }
 0x1e1   :  { %1722 = vmatprep.mubr.bf16.mxu1 %v3251_v63  ;;  %v1103_v34 = vadd.f32 %v3160_v56, %v1084_v42  ;;  %2413 = vmatpush3.bf16.msra.mxu1 %v2702_v24  ;;  %v2703_v56 = vld [vmem:[%s3428_s5 + $0x70] sm:$0xff]   ;;  %v2705_v63 = vld [vmem:[%s3428_s5 + $0x68] sm:$0xff]  }
 0x1e2   :  { %2414 = vmatprep.subr.bf16.mxu1 %v2703_v56  ;;  %2442 = vmatprep.subr.bf16.mxu0 %v2725_v55 }
 0x1e3   :  { %v1115_v0 = vmax.f32 %v1103_v34, 0.0 }
 0x1e4   :  { %2443 = vmatpush3.bf16.msra.mxu0 %v2726_v33 }
 0x1e5   :  { %v1126_v12 = vpack.c.bf16 %v1115_v0, %v1114_v40  ;;  %2444 = vmatprep.subr.bf16.mxu0 %v2727_v49 }
 0x1e7   :  { %1816 = vmatmul.mubr.bf16.gmra.mxu0 %v1126_v12 }
 0x1e8   :  { %1723 = vmatmul.mubr.bf16.gmra.mxu1 %v3234_v21  ;;  %v2704_v21 = vld [vmem:[%s3428_s5 + $0x30] sm:$0xff]   ;;  %2445 = vmatpush3.bf16.msra.mxu0 %v2728_v19 }
 0x1e9   :  { %1732 = vmatprep.mubr.bf16.mxu1 %v3279_v29  ;;  %2415 = vmatpush3.bf16.msra.mxu1 %v2704_v21  ;;  %v2707_v29 = vld [vmem:[%s3428_s5 + $0x60] sm:$0xff]  }
 0x1ea   :  { %2416 = vmatprep.subr.bf16.mxu1 %v2705_v63  ;;  %2446 = vmatprep.subr.bf16.mxu0 %v2729_v41 }
 0x1ec   :  { %2447 = vmatpush3.bf16.msra.mxu0 %v2730_v22 }
 0x1ed   :  { %2448 = vmatprep.subr.bf16.mxu0 %v2731_v16 }
 0x1f0   :  { %1733 = vmatmul.mubr.bf16.gmra.mxu1 %v3266_v8  ;;  %v2706_v8 = vld [vmem:[%s3428_s5 + $0x28] sm:$0xff]   ;;  %2449 = vmatpush3.bf16.msra.mxu0 %v2732_v54 }
 0x1f1   :  { %1742 = vmatprep.mubr.bf16.mxu1 %v1125_v27  ;;  %2417 = vmatpush3.bf16.msra.mxu1 %v2706_v8 }
 0x1f2   :  { %2418 = vmatprep.subr.bf16.mxu1 %v2707_v29 }
 0x1f5   :  { %2419 = vmatpush3.bf16.msra.mxu1 %v2708_v50 }
 0x1f6   :  { %2420 = vmatprep.subr.bf16.mxu1 %v2709_v4 }
 0x1f8   :  { %1743 = vmatmul.mubr.bf16.gmra.mxu1 %v1124_v44 }
 0x1f9   :  { %2421 = vmatpush3.bf16.msra.mxu1 %v2711_v3 }
 0x1fa   :  { %2422 = vmatprep.subr.bf16.mxu1 %v2713_v32 }
 0x1fd   :  { %2423 = vmatpush3.bf16.msra.mxu1 %v2715_v18 }
 0x1fe   :  { %2424 = vmatprep.subr.bf16.mxu1 %v2717_v45 }
 0x201   :  { %2425 = vmatpush3.bf16.msra.mxu1 %v2719_v59 }
 0x202   :  { %2426 = vmatprep.subr.bf16.mxu1 %v2721_v7  ;;  %v2378_v7 = vld [vmem:[%s3427_s4] ss:$0 sm:$0xff] }
 0x205   :  { %2427 = vmatpush3.bf16.msra.mxu1 %v2723_v31 }
 0x260   :  { %v1641_v2 = vpop.f32.mrf.mxu1 }
 0x262   :  { %v1643_v15 = vpop.f32.mrf.mxu1 }
 0x264   :  { %v1645_v17 = vpop.f32.mrf.mxu1 }
 0x266   :  { %v1647_v44 = vpop.f32.mrf.mxu1 }
 0x270   :  { %v1651_v47 = vpop.f32.mrf.mxu1 }
 0x272   :  { %v1653_v60 = vpop.f32.mrf.mxu1 }
 0x274   :  { %v1655_v13 = vpop.f32.mrf.mxu1 }
 0x276   :  { %v1657_v23 = vpop.f32.mrf.mxu1 }
 0x277   :  { %v1787_v20 = vpop.f32.mrf.mxu0 }
 0x279   :  { %v1789_v26 = vpop.f32.mrf.mxu0 }
 0x27b   :  { %v1791_v36 = vpop.f32.mrf.mxu0 }
 0x27d   :  { %v1793_v62 = vpop.f32.mrf.mxu0 }
 0x280   :  { %v3399_v53 = vpop.f32.mrf.mxu1 }
 0x282   :  { %v1663_v57 = vpop.f32.mrf.mxu1 }
 0x284   :  { %v1665_v10 = vpop.f32.mrf.mxu1 }
 0x286   :  { %v1667_v37 = vpop.f32.mrf.mxu1 }
 0x287   :  { %v1797_v25 = vpop.f32.mrf.mxu0 }
 0x289   :  { %v1799_v28 = vpop.f32.mrf.mxu0 }
 0x28b   :  { %v1801_v9 = vpop.f32.mrf.mxu0 }
 0x28d   :  { %v1803_v40 = vpop.f32.mrf.mxu0 }
 0x290   :  { %v3401_v39 = vpop.f32.mrf.mxu1 }
 0x292   :  { %v3403_v61 = vpop.f32.mrf.mxu1 }
 0x294   :  { %v3405_v6 = vpop.f32.mrf.mxu1 }
 0x296   :  { %v3407_v5 = vpop.f32.mrf.mxu1 }
 0x297   :  { %v1807_v27 = vpop.f32.mrf.mxu0 }
 0x299   :  { %v1809_v21 = vpop.f32.mrf.mxu0 }
 0x29b   :  { %v1811_v43 = vpop.f32.mrf.mxu0 }
 0x29d   :  { %v1813_v55 = vpop.f32.mrf.mxu0 }
 0x2a0   :  { %v1714_v51 = vpop.f32.mrf.mxu1 }
 0x2a1   :  { %v1715_v30 = vadd.f32 %v1714_v51, %v1641_v2 }
 0x2a2   :  { %v1716_v52 = vpop.f32.mrf.mxu1 }
 0x2a3   :  { %v1717_v42 = vadd.f32 %v1716_v52, %v1643_v15  ;;  %v1788_v50 = vadd.f32 %v1787_v20, %v1715_v30 }
 0x2a4   :  { %v1718_v58 = vpop.f32.mrf.mxu1 }
 0x2a5   :  { %v1719_v34 = vadd.f32 %v1718_v58, %v1645_v17  ;;  %v1790_v63 = vadd.f32 %v1789_v26, %v1717_v42 }
 0x2a6   :  { %v1720_v0 = vpop.f32.mrf.mxu1 }
 0x2a7   :  { %v1721_v12 = vadd.f32 %v1720_v0, %v1647_v44  ;;  %v1792_v8 = vadd.f32 %v1791_v36, %v1719_v34  ;;  %v1817_v22 = vpop.f32.mrf.mxu0 }
 0x2a8   :  { %v1724_v24 = vpop.f32.mrf.mxu1 }
 0x2a9   :  { %v1794_v56 = vadd.f32 %v1793_v62, %v1721_v12  ;;  %v1725_v3 = vadd.f32 %v1724_v24, %v1651_v47  ;;  %v1826_v18 = vmax.f32 %v1788_v50, %v1792_v8 }
 0x2aa   :  { %v1726_v29 = vpop.f32.mrf.mxu1 }
 0x2ab   :  { %v1827_v4 = vmax.f32 %v1790_v63, %v1794_v56  ;;  %v1727_v14 = vadd.f32 %v1726_v29, %v1653_v60  ;;  %v1798_v46 = vadd.f32 %v1797_v25, %v1725_v3 }
 0x2ac   :  { %v1728_v35 = vpop.f32.mrf.mxu1 }
 0x2ad   :  { %v1729_v32 = vadd.f32 %v1728_v35, %v1655_v13  ;;  %v1834_v59 = vmax.f32 %v1826_v18, %v1827_v4  ;;  %v1800_v31 = vadd.f32 %v1799_v28, %v1727_v14  ;;  %v1819_v13 = vpop.f32.mrf.mxu0  ;;  %v2379_v18 = vld [vmem:[%s3429_s6] ss:$0 sm:$0xff] }
 0x2ae   :  { %v1730_v38 = vpop.f32.mrf.mxu1 }
 0x2af   :  { %v1802_v45 = vadd.f32 %v1801_v9, %v1729_v32  ;;  %v1731_v48 = vadd.f32 %v1730_v38, %v1657_v23  ;;  %v1845_v41 = vadd.f32 %v2378_v7, %v1834_v59  ;;  %v1821_v52 = vpop.f32.mrf.mxu0 }
 0x2b0   :  { %v1734_v1 = vpop.f32.mrf.mxu1 }
 0x2b1   :  { %v1804_v11 = vadd.f32 %v1803_v40, %v1731_v48  ;;  %v1828_v49 = vmax.f32 %v1798_v46, %v1802_v45  ;;  %v1849_v60 = vmax.f32 %v1845_v41, 0.0  ;;  %v1735_v23 = vadd.f32 %v1734_v1, %v3399_v53  ;;  %v1823_v30 = vpop.f32.mrf.mxu0 }
 0x2b2   :  { %v1736_v33 = vpop.f32.mrf.mxu1 }
 0x2b3   :  { %v1829_v19 = vmax.f32 %v1800_v31, %v1804_v11  ;;  %v1737_v2 = vadd.f32 %v1736_v33, %v1663_v57  ;;  %v1853_v51 = vpack.c.bf16 %v1849_v60, %v1849_v60  ;;  %v1808_v40 = vadd.f32 %v1807_v27, %v1735_v23 }
 0x2b4   :  { %v1738_v16 = vpop.f32.mrf.mxu1 }
 0x2b5   :  { %v1835_v54 = vmax.f32 %v1828_v49, %v1829_v19  ;;  %v1739_v15 = vadd.f32 %v1738_v16, %v1665_v10  ;;  %v1810_v62 = vadd.f32 %v1809_v21, %v1737_v2 }
 0x2b6   :  { %v1740_v17 = vpop.f32.mrf.mxu1 }
 0x2b7   :  { %v1741_v44 = vadd.f32 %v1740_v17, %v1667_v37  ;;  %v1846_v47 = vadd.f32 %v2378_v7, %v1835_v54  ;;  %v1812_v25 = vadd.f32 %v1811_v43, %v1739_v15 }
 0x2b8   :  { %v1744_v20 = vpop.f32.mrf.mxu1 }
 0x2b9   :  { %v1814_v26 = vadd.f32 %v1813_v55, %v1741_v44  ;;  %v1850_v36 = vmax.f32 %v1846_v47, 0.0  ;;  %v1745_v10 = vadd.f32 %v1744_v20, %v3401_v39  ;;  %v1830_v53 = vmax.f32 %v1808_v40, %v1812_v25 }
 0x2ba   :  { %v1746_v28 = vpop.f32.mrf.mxu1 }
 0x2bb   :  { %v1854_v9 = vpack.c.bf16 %v1850_v36, %v1850_v36  ;;  %v1831_v58 = vmax.f32 %v1810_v62, %v1814_v26  ;;  %v1747_v37 = vadd.f32 %v1746_v28, %v3403_v61  ;;  %v1818_v56 = vadd.f32 %v1817_v22, %v1745_v10 }
 0x2bc   :  { %v1748_v57 = vpop.f32.mrf.mxu1 }
 0x2bd   :  { %v1749_v42 = vadd.f32 %v1748_v57, %v3405_v6  ;;  %2152 = vmatprep.mubr.bf16.mxu1 %v1854_v9  ;;  %v1836_v24 = vmax.f32 %v1830_v53, %v1831_v58  ;;  %v1820_v21 = vadd.f32 %v1819_v13, %v1747_v37 }
 0x2be   :  { %v1750_v34 = vpop.f32.mrf.mxu1  ;;  %2153 = vmatmul.mubr.bf16.vlgmr.msra.gmra.mxu1 %v1853_v51 }
 0x2bf   :  { %v1822_v0 = vadd.f32 %v1821_v52, %v1749_v42  ;;  %v1751_v12 = vadd.f32 %v1750_v34, %v3407_v5  ;;  %v1847_v29 = vadd.f32 %v2378_v7, %v1836_v24 }
 0x2c1   :  { %v1824_v27 = vadd.f32 %v1823_v30, %v1751_v12  ;;  %v1832_v63 = vmax.f32 %v1818_v56, %v1822_v0  ;;  %v1851_v61 = vmax.f32 %v1847_v29, 0.0 }
 0x2c3   :  { %v1833_v8 = vmax.f32 %v1820_v21, %v1824_v27  ;;  %v1855_v35 = vpack.c.bf16 %v1851_v61, %v1851_v61 }
 0x2c5   :  { %v1837_v39 = vmax.f32 %v1832_v63, %v1833_v8 }
 0x2c7   :  { %v1848_v50 = vadd.f32 %v2378_v7, %v1837_v39 }
 0x2c9   :  { %v1852_v4 = vmax.f32 %v1848_v50, 0.0 }
 0x2cb   :  { %v1856_v6 = vpack.c.bf16 %v1852_v4, %v1852_v4 }
 0x2cd   :  { %2192 = vmatprep.mubr.bf16.mxu0 %v1856_v6 }
 0x2ce   :  { %2193 = vmatmul.mubr.bf16.vlgmr.msra.gmra.mxu0 %v1855_v35 }
 0x37e   :  { %v2428_v3 = vpop.f32.mrf.mxu1 }
 0x380   :  { %v2429_v14 = vpop.f32.mrf.mxu1 }
 0x381   :  { %v2430_v43 = vadd.f32 %v2429_v14, %v2428_v3 }
 0x382   :  { %v2431_v32 = vpop.f32.mrf.mxu1 }
 0x383   :  { %v2155_v48 = vadd.f32 %v2430_v43, %v2379_v18 }
 0x384   :  { %v2432_v5 = vpop.f32.mrf.mxu1 }
 0x38e   :  { %v2450_v38 = vpop.f32.mrf.mxu0 }
 0x390   :  { %v2451_v45 = vpop.f32.mrf.mxu0 }
 0x391   :  { %v2452_v59 = vadd.f32 %v2451_v45, %v2450_v38 }
 0x392   :  { %v2453_v1 = vpop.f32.mrf.mxu0 }
 0x393   :  { %v2195_v7 = vadd.f32 %v2452_v59, %v2155_v48 }
 0x394   :  { %v2454_v46 = vpop.f32.mrf.mxu0 }
 0x395   :  { %2200 = vmax.xlane.f32.xlu0 %v2195_v7 }
 0x41e   :  { %v2201_v31 = vpop.xlane.xlu0 %2200 }
 0x41f   :  { %v2202_v11 = vsub.f32 %v2195_v7, %v2201_v31 }
 0x421   :  { %v2203_v55 = vmul.f32 1.442695, %v2202_v11 }
 0x423   :  { %2733 = vpow2.f32 %v2203_v55 }
 0x430   :  { %v2734_v33 = vpop.eup %2733 }
 0x431   :  { %2205 = vadd.xlane.f32.xlu0 %v2734_v33 }
 0x4ba   :  { %v2206_v49 = vpop.xlane.xlu0 %2205 }
 0x4bb   :  { %2735 = vlog2.f32 %v2206_v49 }
 0x4c8   :  { %v2736_v19 = vpop.eup %2735 }
 0x4c9   :  { %v2208_v41 = vmul.f32 0.6931472, %v2736_v19 }
 0x4cb   :  { %v2209_v22 = vsub.f32 %v2202_v11, %v2208_v41 }
 0x4cd   :  { %2210 = vst [vmem:[%s3430_s7] sm:$0xff] %v2209_v22 }
 0x4ce   :  { %2215 = vsyncpa [#allocation3], 1 }
 0x4cf   :  { %2216 = vsyncpa [#allocation5], 1 }

</bundles_post_ra>
